<compile_context>
chip_gen: v6e
topology: v6e:2x2x1
jax: 0.10.0
libtpu: 0.0.40
codegen_flags: <defaults>
</compile_context>

<pallas_src>
import functools

import jax
import jax.numpy as jnp
from jax.experimental import pallas as pl
from jax.experimental.pallas import tpu as pltpu


# ----------------------------------------------------------------------------
# Generation-dependent depthwise dtype (bf16 VALUs exist on v6e/v7x only).
# ----------------------------------------------------------------------------
def _default_dw_dtype():
    try:
        kind = jax.devices()[0].device_kind.lower()
    except Exception:
        return jnp.float32
    if "v6" in kind or "v7" in kind or "7x" in kind:
        return jnp.bfloat16
    return jnp.float32


# ----------------------------------------------------------------------------
# Pallas kernel: NB images per grid step, everything in (C, NB*H*W) layout.
# ----------------------------------------------------------------------------
def _inverted_residual_kernel(x_ref, *refs, has_expand, use_res, H, W, dw_dtype):
    if has_expand:
        w1_ref, b1_ref, wdw_ref, b2_ref, w3_ref, b3_ref, o_ref = refs
    else:
        wdw_ref, b2_ref, w3_ref, b3_ref, o_ref = refs

    HW = H * W
    x = x_ref[...]                                      # (Cin, L) f32, L = NB*H*W
    L = x.shape[1]

    # ---- 1x1 expansion conv + BN + ReLU (MXU: bf16 operands, f32 accumulate) ----
    if has_expand:
        h = jnp.dot(w1_ref[...], x.astype(jnp.bfloat16),
                    preferred_element_type=jnp.float32)        # (Chid, L)
        h = jnp.maximum(h + b1_ref[...], 0.0)
    else:
        h = x

    # ---- 3x3 depthwise conv (padding=1) + BN + ReLU --------------------------
    # Horizontal-then-vertical decomposition: 2 lane rolls for the left/right
    # neighbours (column masks baked in once), 3 per-row weighted sums, then
    # only 2 vertical rolls (+/- W) gated by per-image row masks.  Column masks
    # are invariant under whole-row shifts, so this matches the 9-tap conv.
    lane = jax.lax.broadcasted_iota(jnp.int32, (1, L), 1)
    col = lane % W
    pix = lane % HW                                     # pixel index within its image
    ok_left = (col != 0).astype(dw_dtype)               # x-1 exists
    ok_right = (col != (W - 1)).astype(dw_dtype)        # x+1 exists
    ok_up = (pix >= W).astype(dw_dtype)                 # y-1 exists (same image)
    ok_down = (pix < (H - 1) * W).astype(dw_dtype)      # y+1 exists (same image)

    hd = h.astype(dw_dtype)                             # bf16 taps on v6e/v7x, f32 on v5e
    wdw = wdw_ref[...]                                  # (Chid, 9) in dw_dtype
    hl = pltpu.roll(hd, 1, axis=1) * ok_left            # value at (y, x-1), masked
    hr = pltpu.roll(hd, L - 1, axis=1) * ok_right       # value at (y, x+1), masked

    def wcol(k):                                        # (Chid, 1), lane-broadcast
        return wdw[:, k:k + 1]

    # Per-kernel-row horizontal sums t[ky][p] = sum_kx w[ky,kx] * h[row(p), col(p)+kx-1]
    t = [wcol(3 * ky + 0) * hl + wcol(3 * ky + 1) * hd + wcol(3 * ky + 2) * hr
         for ky in range(3)]

    # Accumulate rows in f32; start from the centre row (includes the centre tap).
    acc = t[1].astype(jnp.float32)
    acc = acc + pltpu.roll(t[0], W, axis=1) * ok_up         # contribution of row y-1
    acc = acc + pltpu.roll(t[2], L - W, axis=1) * ok_down   # contribution of row y+1
    acc = jnp.maximum(acc + b2_ref[...], 0.0)

    # ---- 1x1 projection conv + BN (MXU: bf16 operands, f32 accumulate) ----
    # Note: K dims (Cin / Chid) are tiny here; at real channel counts keep the
    # full channel count as one K block per lane tile (128-aligned on v5e,
    # 256 on v6e/v7x).
    y = jnp.dot(w3_ref[...], acc.astype(jnp.bfloat16),
                preferred_element_type=jnp.float32)     # (Cout, L)
    y = y + b3_ref[...]

    if use_res:                                         # stride == 1 and Cin == Cout
        y = y + x

    o_ref[...] = y.astype(o_ref.dtype)


# ----------------------------------------------------------------------------
# Parameter setup / BN folding (plain JAX glue on the host)
# ----------------------------------------------------------------------------
def init_params(key, inp, oup, expand_ratio):
    """Deterministic synthetic parameters, shaped like the PyTorch module."""
    hidden = int(round(inp * expand_ratio))
    keys = iter(jax.random.split(key, 16))

    def bn_params(c):
        return dict(
            gamma=jax.random.uniform(next(keys), (c,), minval=0.8, maxval=1.2),
            beta=0.1 * jax.random.normal(next(keys), (c,)),
            mean=0.1 * jax.random.normal(next(keys), (c,)),
            var=jax.random.uniform(next(keys), (c,), minval=0.5, maxval=1.5),
        )

    p = {}
    if expand_ratio != 1:
        p["w1"] = 0.1 * jax.random.normal(next(keys), (hidden, inp, 1, 1))   # OIHW 1x1
        p["bn1"] = bn_params(hidden)
    p["wdw"] = 0.1 * jax.random.normal(next(keys), (hidden, 1, 3, 3))        # depthwise OIHW
    p["bn2"] = bn_params(hidden)
    p["w3"] = 0.1 * jax.random.normal(next(keys), (oup, hidden, 1, 1))       # OIHW 1x1
    p["bn3"] = bn_params(oup)
    return p


def _fold_params(params, expand_ratio, eps, dw_dtype):
    """Fold eval-mode BatchNorm into the (bias-free) conv weights; bf16 matmul weights."""
    has_expand = expand_ratio != 1

    def fold(bn):
        scale = bn["gamma"] / jnp.sqrt(bn["var"] + eps)
        shift = bn["beta"] - bn["mean"] * scale
        return scale, shift

    folded = {}
    if has_expand:
        s1, t1 = fold(params["bn1"])
        folded["w1"] = (params["w1"][:, :, 0, 0] * s1[:, None]).astype(jnp.bfloat16)  # (Chid, Cin)
        folded["b1"] = t1[:, None].astype(jnp.float32)                                 # (Chid, 1)
    s2, t2 = fold(params["bn2"])
    chid = params["wdw"].shape[0]
    folded["wdw"] = (params["wdw"][:, 0].reshape(chid, 9) * s2[:, None]).astype(dw_dtype)  # (Chid, 9)
    folded["b2"] = t2[:, None].astype(jnp.float32)                                     # (Chid, 1)
    s3, t3 = fold(params["bn3"])
    folded["w3"] = (params["w3"][:, :, 0, 0] * s3[:, None]).astype(jnp.bfloat16)       # (Cout, Chid)
    folded["b3"] = t3[:, None].astype(jnp.float32)                                     # (Cout, 1)
    return folded


def _pick_images_per_step(N, HW, lanes_target=2048):
    """Largest divisor of N whose lane extent stays <= lanes_target (amortizes
    per-grid-step overhead while keeping blocks modest)."""
    best = 1
    for nb in range(1, N + 1):
        if N % nb == 0 and nb * HW <= max(lanes_target, HW):
            best = nb
    return best


# ----------------------------------------------------------------------------
# Wrapper: NCHW in -> NCHW out (matches the PyTorch module).
# ----------------------------------------------------------------------------
def inverted_residual(x_nchw, params, *, stride, expand_ratio, eps=1e-5,
                      images_per_step=None, dw_dtype=None):
    N, Cin, H, W = x_nchw.shape
    HW = H * W
    if dw_dtype is None:
        dw_dtype = _default_dw_dtype()
    folded = _fold_params(params, expand_ratio, eps, dw_dtype)
    has_expand = expand_ratio != 1
    Cout = folded["w3"].shape[0]
    use_res = (stride == 1 and Cin == Cout)

    if images_per_step is None:
        NB = _pick_images_per_step(N, HW)
    else:
        NB = images_per_step
        assert N % NB == 0, "images_per_step must divide the batch size"
    G = N // NB

    # NCHW -> (Cin, N*H*W): batch folded into the lane axis (one cheap XLA
    # transpose in HBM); per-image masks in the kernel keep the math exact.
    x_flat = jnp.transpose(x_nchw, (1, 0, 2, 3)).reshape(Cin, N * HW).astype(jnp.float32)

    kernel = functools.partial(
        _inverted_residual_kernel,
        has_expand=has_expand, use_res=use_res, H=H, W=W, dw_dtype=dw_dtype)

    def const(arr):
        nd = arr.ndim
        return pl.BlockSpec(arr.shape, lambda g, _nd=nd: (0,) * _nd)

    in_specs = [pl.BlockSpec((Cin, NB * HW), lambda g: (0, g))]
    operands = [x_flat]
    if has_expand:
        in_specs += [const(folded["w1"]), const(folded["b1"])]
        operands += [folded["w1"], folded["b1"]]
    in_specs += [const(folded["wdw"]), const(folded["b2"]),
                 const(folded["w3"]), const(folded["b3"])]
    operands += [folded["wdw"], folded["b2"], folded["w3"], folded["b3"]]

    grid_spec = pltpu.PrefetchScalarGridSpec(
        num_scalar_prefetch=0,
        grid=(G,),
        in_specs=in_specs,
        out_specs=pl.BlockSpec((Cout, NB * HW), lambda g: (0, g)),
    )

    y = pl.pallas_call(
        kernel,
        out_shape=jax.ShapeDtypeStruct((Cout, N * HW), jnp.float32),
        grid_spec=grid_spec,
        compiler_params=pltpu.CompilerParams(dimension_semantics=("parallel",)),
    )(*operands)

    # (Cout, N*H*W) -> NCHW.  Strided depthwise == full conv subsampled at the
    # output positions, and the 1x1 projection is pointwise, so subsampling the
    # full-resolution kernel output here is exact.
    y = y.reshape(Cout, N, H, W)
    if stride != 1:
        y = y[:, :, ::stride, ::stride]
    return jnp.transpose(y, (1, 0, 2, 3))


# ----------------------------------------------------------------------------
# Pure-JAX/XLA reference (unfused convs + eval-mode BN), used only to verify.
# ----------------------------------------------------------------------------
def ref_inverted_residual(x, params, *, stride, expand_ratio, eps=1e-5):
    def bn(h, p):
        s = p["gamma"] / jnp.sqrt(p["var"] + eps)
        t = p["beta"] - p["mean"] * s
        return h * s[None, :, None, None] + t[None, :, None, None]

    def conv(h, w, stride=1, padding=0, groups=1):
        return jax.lax.conv_general_dilated(
            h, w, window_strides=(stride, stride),
            padding=[(padding, padding), (padding, padding)],
            feature_group_count=groups,
            dimension_numbers=("NCHW", "OIHW", "NCHW"),
            precision=jax.lax.Precision.HIGHEST)

    x = x.astype(jnp.float32)
    out = x
    if expand_ratio != 1:
        out = jax.nn.relu(bn(conv(out, params["w1"]), params["bn1"]))
    ch = params["wdw"].shape[0]
    out = jax.nn.relu(bn(conv(out, params["wdw"], stride=stride, padding=1, groups=ch),
                         params["bn2"]))
    out = bn(conv(out, params["w3"]), params["bn3"])
    if stride == 1 and x.shape[1] == out.shape[1]:
        out = out + x
    return out


if __name__ == "__main__":
    key = jax.random.PRNGKey(0)

    def run_case(N, Cin, Cout, H, W, stride, expand_ratio, case_key):
        kx_, kp = jax.random.split(case_key)
        x = jax.random.normal(kx_, (N, Cin, H, W), jnp.float32)   # NCHW, as in PyTorch
        params = init_params(kp, Cin, Cout, expand_ratio)

        y = inverted_residual(x, params, stride=stride, expand_ratio=expand_ratio)
        y = jax.block_until_ready(y)

        y_ref = ref_inverted_residual(x, params, stride=stride, expand_ratio=expand_ratio)
        assert y.shape == y_ref.shape, (y.shape, y_ref.shape)
        max_err = float(jnp.max(jnp.abs(y - y_ref)))
        scale = float(jnp.max(jnp.abs(y_ref)))
        tol = 5e-2 * max(1.0, scale)   # bf16 MXU operands (+ bf16 dw taps on v6e/v7x)
        assert max_err <= tol, f"max abs error {max_err} > tol {tol}"
        return y

    k1, k2, k3 = jax.random.split(key, 3)
    # Residual path: stride=1, inp == oup, expand_ratio=6 -> hidden_dim = 48.
    y1 = run_case(2, 8, 8, 16, 16, stride=1, expand_ratio=6, case_key=k1)
    assert y1.shape == (2, 8, 16, 16)
    # expand_ratio == 1 variant (module omits the expansion conv).
    y2 = run_case(2, 8, 8, 16, 16, stride=1, expand_ratio=1, case_key=k2)
    assert y2.shape == (2, 8, 16, 16)
    # stride=2 downsampling variant (no residual), now actually exercised.
    y3 = run_case(2, 8, 16, 16, 16, stride=2, expand_ratio=6, case_key=k3)
    assert y3.shape == (2, 16, 8, 8)

    print("KERNEL_OK")
</pallas_src>

<mosaic_0001>
module attributes {stable_mosaic.version = 11 : i64} {
  func.func @_inverted_residual_kernel(%arg0: i32, %arg1: memref<8x512xf32, #tpu.memory_space<vmem>>, %arg2: memref<48x8xbf16, #tpu.memory_space<vmem>>, %arg3: memref<48x1xf32, #tpu.memory_space<vmem>>, %arg4: memref<48x9xf32, #tpu.memory_space<vmem>>, %arg5: memref<48x1xf32, #tpu.memory_space<vmem>>, %arg6: memref<8x48xbf16, #tpu.memory_space<vmem>>, %arg7: memref<8x1xf32, #tpu.memory_space<vmem>>, %arg8: memref<8x512xf32, #tpu.memory_space<vmem>>) attributes {dimension_semantics = [#tpu.dimension_semantics<parallel>], iteration_bounds = array<i64: 1>, scalar_prefetch = 0 : i64, scratch_operands = 0 : i64, tpu.core_type = #tpu.core_type<tc>, window_params = [{transform_indices = @transform_0, window_bounds = array<i64: 8, 512>}, {pipeline_mode = #tpu.pipeline_mode<synchronous>, transform_indices = @transform_1, window_bounds = array<i64: 48, 8>}, {pipeline_mode = #tpu.pipeline_mode<synchronous>, transform_indices = @transform_2, window_bounds = array<i64: 48, 1>}, {pipeline_mode = #tpu.pipeline_mode<synchronous>, transform_indices = @transform_3, window_bounds = array<i64: 48, 9>}, {pipeline_mode = #tpu.pipeline_mode<synchronous>, transform_indices = @transform_4, window_bounds = array<i64: 48, 1>}, {pipeline_mode = #tpu.pipeline_mode<synchronous>, transform_indices = @transform_5, window_bounds = array<i64: 8, 48>}, {pipeline_mode = #tpu.pipeline_mode<synchronous>, transform_indices = @transform_6, window_bounds = array<i64: 8, 1>}, {transform_indices = @transform_7, window_bounds = array<i64: 8, 512>}]} {
    %c0 = arith.constant 0 : index
    %c0_0 = arith.constant 0 : index
    %0 = vector.load %arg1[%c0, %c0_0] : memref<8x512xf32, #tpu.memory_space<vmem>>, vector<8x512xf32>
    %c0_1 = arith.constant 0 : index
    %c0_2 = arith.constant 0 : index
    %1 = vector.load %arg2[%c0_1, %c0_2] : memref<48x8xbf16, #tpu.memory_space<vmem>>, vector<48x8xbf16>
    %2 = arith.truncf %0 : vector<8x512xf32> to vector<8x512xbf16>
    %cst = arith.constant dense<0.000000e+00> : vector<48x512xf32>
    %3 = tpu.matmul %1, %2, %cst {dimension_numbers = #tpu.dot_dimension_numbers<[1], [0], [0], [1], [0, 0, 1, 1], [], []>} : vector<48x8xbf16>, vector<8x512xbf16>, vector<48x512xf32> -> vector<48x512xf32>
    %c0_3 = arith.constant 0 : index
    %c0_4 = arith.constant 0 : index
    %4 = vector.load %arg3[%c0_3, %c0_4] : memref<48x1xf32, #tpu.memory_space<vmem>>, vector<48x1xf32>
    %5 = vector.broadcast %4 : vector<48x1xf32> to vector<48x512xf32>
    %6 = arith.addf %3, %5 : vector<48x512xf32>
    %cst_5 = arith.constant 0.000000e+00 : f32
    %7 = vector.broadcast %cst_5 : f32 to vector<48x512xf32>
    %8 = arith.maximumf %6, %7 : vector<48x512xf32>
    %9 = tpu.iota {dimensions = array<i32: 1>} : vector<1x512xi32>
    %c16_i32 = arith.constant 16 : i32
    %c0_i32 = arith.constant 0 : i32
    %10 = arith.cmpi eq, %c16_i32, %c0_i32 : i32
    %c1_i32 = arith.constant 1 : i32
    %11 = arith.select %10, %c1_i32, %c16_i32 : i32
    %12 = vector.broadcast %11 : i32 to vector<1x512xi32>
    %13 = arith.remsi %9, %12 : vector<1x512xi32>
    %c0_i32_6 = arith.constant 0 : i32
    %14 = vector.broadcast %c0_i32_6 : i32 to vector<1x512xi32>
    %15 = arith.cmpi ne, %13, %14 : vector<1x512xi32>
    %c0_i32_7 = arith.constant 0 : i32
    %16 = vector.broadcast %c0_i32_7 : i32 to vector<1x512xi32>
    %17 = arith.cmpi slt, %13, %16 : vector<1x512xi32>
    %c0_i32_8 = arith.constant 0 : i32
    %18 = arith.cmpi slt, %11, %c0_i32_8 : i32
    %19 = vector.broadcast %18 : i1 to vector<1x512xi1>
    %20 = vector.broadcast %19 : vector<1x512xi1> to vector<1x512xi1>
    %21 = arith.xori %17, %20 : vector<1x512xi1>
    %22 = arith.andi %21, %15 : vector<1x512xi1>
    %23 = vector.broadcast %11 : i32 to vector<1x512xi32>
    %24 = arith.addi %13, %23 : vector<1x512xi32>
    %25 = arith.select %22, %24, %13 : vector<1x512xi1>, vector<1x512xi32>
    %c256_i32 = arith.constant 256 : i32
    %c0_i32_9 = arith.constant 0 : i32
    %26 = arith.cmpi eq, %c256_i32, %c0_i32_9 : i32
    %c1_i32_10 = arith.constant 1 : i32
    %27 = arith.select %26, %c1_i32_10, %c256_i32 : i32
    %28 = vector.broadcast %27 : i32 to vector<1x512xi32>
    %29 = arith.remsi %9, %28 : vector<1x512xi32>
    %c0_i32_11 = arith.constant 0 : i32
    %30 = vector.broadcast %c0_i32_11 : i32 to vector<1x512xi32>
    %31 = arith.cmpi ne, %29, %30 : vector<1x512xi32>
    %c0_i32_12 = arith.constant 0 : i32
    %32 = vector.broadcast %c0_i32_12 : i32 to vector<1x512xi32>
    %33 = arith.cmpi slt, %29, %32 : vector<1x512xi32>
    %c0_i32_13 = arith.constant 0 : i32
    %34 = arith.cmpi slt, %27, %c0_i32_13 : i32
    %35 = vector.broadcast %34 : i1 to vector<1x512xi1>
    %36 = vector.broadcast %35 : vector<1x512xi1> to vector<1x512xi1>
    %37 = arith.xori %33, %36 : vector<1x512xi1>
    %38 = arith.andi %37, %31 : vector<1x512xi1>
    %39 = vector.broadcast %27 : i32 to vector<1x512xi32>
    %40 = arith.addi %29, %39 : vector<1x512xi32>
    %41 = arith.select %38, %40, %29 : vector<1x512xi1>, vector<1x512xi32>
    %c0_i32_14 = arith.constant 0 : i32
    %42 = vector.broadcast %c0_i32_14 : i32 to vector<1x512xi32>
    %43 = arith.cmpi ne, %25, %42 : vector<1x512xi32>
    %44 = arith.extui %43 : vector<1x512xi1> to vector<1x512xi32>
    %45 = arith.sitofp %44 : vector<1x512xi32> to vector<1x512xf32>
    %c15_i32 = arith.constant 15 : i32
    %46 = vector.broadcast %c15_i32 : i32 to vector<1x512xi32>
    %47 = arith.cmpi ne, %25, %46 : vector<1x512xi32>
    %48 = arith.extui %47 : vector<1x512xi1> to vector<1x512xi32>
    %49 = arith.sitofp %48 : vector<1x512xi32> to vector<1x512xf32>
    %c16_i32_15 = arith.constant 16 : i32
    %50 = vector.broadcast %c16_i32_15 : i32 to vector<1x512xi32>
    %51 = arith.cmpi sge, %41, %50 : vector<1x512xi32>
    %52 = arith.extui %51 : vector<1x512xi1> to vector<1x512xi32>
    %53 = arith.sitofp %52 : vector<1x512xi32> to vector<1x512xf32>
    %c240_i32 = arith.constant 240 : i32
    %54 = vector.broadcast %c240_i32 : i32 to vector<1x512xi32>
    %55 = arith.cmpi slt, %41, %54 : vector<1x512xi32>
    %56 = arith.extui %55 : vector<1x512xi1> to vector<1x512xi32>
    %57 = arith.sitofp %56 : vector<1x512xi32> to vector<1x512xf32>
    %c0_16 = arith.constant 0 : index
    %c0_17 = arith.constant 0 : index
    %58 = vector.load %arg4[%c0_16, %c0_17] : memref<48x9xf32, #tpu.memory_space<vmem>>, vector<48x9xf32>
    %c1_i32_18 = arith.constant 1 : i32
    %59 = tpu.dynamic_rotate %8 by %c1_i32_18 dim 1 : vector<48x512xf32>, i32 -> vector<48x512xf32>
    %60 = vector.broadcast %45 : vector<1x512xf32> to vector<48x512xf32>
    %61 = arith.mulf %59, %60 : vector<48x512xf32>
    %c511_i32 = arith.constant 511 : i32
    %62 = tpu.dynamic_rotate %8 by %c511_i32 dim 1 : vector<48x512xf32>, i32 -> vector<48x512xf32>
    %63 = vector.broadcast %49 : vector<1x512xf32> to vector<48x512xf32>
    %64 = arith.mulf %62, %63 : vector<48x512xf32>
    %65 = vector.extract_strided_slice %58 {offsets = [0, 0], sizes = [48, 1], strides = [1, 1]} : vector<48x9xf32> to vector<48x1xf32>
    %66 = vector.broadcast %65 : vector<48x1xf32> to vector<48x512xf32>
    %67 = arith.mulf %66, %61 : vector<48x512xf32>
    %68 = vector.extract_strided_slice %58 {offsets = [0, 1], sizes = [48, 1], strides = [1, 1]} : vector<48x9xf32> to vector<48x1xf32>
    %69 = vector.broadcast %68 : vector<48x1xf32> to vector<48x512xf32>
    %70 = arith.mulf %69, %8 : vector<48x512xf32>
    %71 = arith.addf %67, %70 : vector<48x512xf32>
    %72 = vector.extract_strided_slice %58 {offsets = [0, 2], sizes = [48, 1], strides = [1, 1]} : vector<48x9xf32> to vector<48x1xf32>
    %73 = vector.broadcast %72 : vector<48x1xf32> to vector<48x512xf32>
    %74 = arith.mulf %73, %64 : vector<48x512xf32>
    %75 = arith.addf %71, %74 : vector<48x512xf32>
    %76 = vector.extract_strided_slice %58 {offsets = [0, 3], sizes = [48, 1], strides = [1, 1]} : vector<48x9xf32> to vector<48x1xf32>
    %77 = vector.broadcast %76 : vector<48x1xf32> to vector<48x512xf32>
    %78 = arith.mulf %77, %61 : vector<48x512xf32>
    %79 = vector.extract_strided_slice %58 {offsets = [0, 4], sizes = [48, 1], strides = [1, 1]} : vector<48x9xf32> to vector<48x1xf32>
    %80 = vector.broadcast %79 : vector<48x1xf32> to vector<48x512xf32>
    %81 = arith.mulf %80, %8 : vector<48x512xf32>
    %82 = arith.addf %78, %81 : vector<48x512xf32>
    %83 = vector.extract_strided_slice %58 {offsets = [0, 5], sizes = [48, 1], strides = [1, 1]} : vector<48x9xf32> to vector<48x1xf32>
    %84 = vector.broadcast %83 : vector<48x1xf32> to vector<48x512xf32>
    %85 = arith.mulf %84, %64 : vector<48x512xf32>
    %86 = arith.addf %82, %85 : vector<48x512xf32>
    %87 = vector.extract_strided_slice %58 {offsets = [0, 6], sizes = [48, 1], strides = [1, 1]} : vector<48x9xf32> to vector<48x1xf32>
    %88 = vector.broadcast %87 : vector<48x1xf32> to vector<48x512xf32>
    %89 = arith.mulf %88, %61 : vector<48x512xf32>
    %90 = vector.extract_strided_slice %58 {offsets = [0, 7], sizes = [48, 1], strides = [1, 1]} : vector<48x9xf32> to vector<48x1xf32>
    %91 = vector.broadcast %90 : vector<48x1xf32> to vector<48x512xf32>
    %92 = arith.mulf %91, %8 : vector<48x512xf32>
    %93 = arith.addf %89, %92 : vector<48x512xf32>
    %94 = vector.extract_strided_slice %58 {offsets = [0, 8], sizes = [48, 1], strides = [1, 1]} : vector<48x9xf32> to vector<48x1xf32>
    %95 = vector.broadcast %94 : vector<48x1xf32> to vector<48x512xf32>
    %96 = arith.mulf %95, %64 : vector<48x512xf32>
    %97 = arith.addf %93, %96 : vector<48x512xf32>
    %c16_i32_19 = arith.constant 16 : i32
    %98 = tpu.dynamic_rotate %75 by %c16_i32_19 dim 1 : vector<48x512xf32>, i32 -> vector<48x512xf32>
    %99 = vector.broadcast %53 : vector<1x512xf32> to vector<48x512xf32>
    %100 = arith.mulf %98, %99 : vector<48x512xf32>
    %101 = arith.addf %86, %100 : vector<48x512xf32>
    %c496_i32 = arith.constant 496 : i32
    %102 = tpu.dynamic_rotate %97 by %c496_i32 dim 1 : vector<48x512xf32>, i32 -> vector<48x512xf32>
    %103 = vector.broadcast %57 : vector<1x512xf32> to vector<48x512xf32>
    %104 = arith.mulf %102, %103 : vector<48x512xf32>
    %105 = arith.addf %101, %104 : vector<48x512xf32>
    %c0_20 = arith.constant 0 : index
    %c0_21 = arith.constant 0 : index
    %106 = vector.load %arg5[%c0_20, %c0_21] : memref<48x1xf32, #tpu.memory_space<vmem>>, vector<48x1xf32>
    %107 = vector.broadcast %106 : vector<48x1xf32> to vector<48x512xf32>
    %108 = arith.addf %105, %107 : vector<48x512xf32>
    %cst_22 = arith.constant 0.000000e+00 : f32
    %109 = vector.broadcast %cst_22 : f32 to vector<48x512xf32>
    %110 = arith.maximumf %108, %109 : vector<48x512xf32>
    %c0_23 = arith.constant 0 : index
    %c0_24 = arith.constant 0 : index
    %111 = vector.load %arg6[%c0_23, %c0_24] : memref<8x48xbf16, #tpu.memory_space<vmem>>, vector<8x48xbf16>
    %112 = arith.truncf %110 : vector<48x512xf32> to vector<48x512xbf16>
    %cst_25 = arith.constant dense<0.000000e+00> : vector<8x512xf32>
    %113 = tpu.matmul %111, %112, %cst_25 {dimension_numbers = #tpu.dot_dimension_numbers<[1], [0], [0], [1], [0, 0, 1, 1], [], []>} : vector<8x48xbf16>, vector<48x512xbf16>, vector<8x512xf32> -> vector<8x512xf32>
    %c0_26 = arith.constant 0 : index
    %c0_27 = arith.constant 0 : index
    %114 = vector.load %arg7[%c0_26, %c0_27] : memref<8x1xf32, #tpu.memory_space<vmem>>, vector<8x1xf32>
    %115 = vector.broadcast %114 : vector<8x1xf32> to vector<8x512xf32>
    %116 = arith.addf %113, %115 : vector<8x512xf32>
    %117 = arith.addf %116, %0 : vector<8x512xf32>
    %c0_28 = arith.constant 0 : index
    %c0_29 = arith.constant 0 : index
    %118 = vector.load %arg8[%c0_28, %c0_29] : memref<8x512xf32, #tpu.memory_space<vmem>>, vector<8x512xf32>
    tpu.vector_store %arg8[%c0_28, %c0_29], %117 {strides = array<i32>} : memref<8x512xf32, #tpu.memory_space<vmem>>, vector<8x512xf32>,
    return
  }
  func.func @transform_0(%arg0: i32) -> (i32, i32) {
    %c0_i32 = arith.constant 0 : i32
    %c0_i32_0 = arith.constant 0 : i32
    return %c0_i32, %arg0 : i32, i32
  }
  func.func @transform_1(%arg0: i32) -> (i32, i32) {
    %c0_i32 = arith.constant 0 : i32
    %c0_i32_0 = arith.constant 0 : i32
    %c0_i32_1 = arith.constant 0 : i32
    return %c0_i32, %c0_i32_0 : i32, i32
  }
  func.func @transform_2(%arg0: i32) -> (i32, i32) {
    %c0_i32 = arith.constant 0 : i32
    %c0_i32_0 = arith.constant 0 : i32
    %c0_i32_1 = arith.constant 0 : i32
    return %c0_i32, %c0_i32_0 : i32, i32
  }
  func.func @transform_3(%arg0: i32) -> (i32, i32) {
    %c0_i32 = arith.constant 0 : i32
    %c0_i32_0 = arith.constant 0 : i32
    %c0_i32_1 = arith.constant 0 : i32
    return %c0_i32, %c0_i32_0 : i32, i32
  }
  func.func @transform_4(%arg0: i32) -> (i32, i32) {
    %c0_i32 = arith.constant 0 : i32
    %c0_i32_0 = arith.constant 0 : i32
    %c0_i32_1 = arith.constant 0 : i32
    return %c0_i32, %c0_i32_0 : i32, i32
  }
  func.func @transform_5(%arg0: i32) -> (i32, i32) {
    %c0_i32 = arith.constant 0 : i32
    %c0_i32_0 = arith.constant 0 : i32
    %c0_i32_1 = arith.constant 0 : i32
    return %c0_i32, %c0_i32_0 : i32, i32
  }
  func.func @transform_6(%arg0: i32) -> (i32, i32) {
    %c0_i32 = arith.constant 0 : i32
    %c0_i32_0 = arith.constant 0 : i32
    %c0_i32_1 = arith.constant 0 : i32
    return %c0_i32, %c0_i32_0 : i32, i32
  }
  func.func @transform_7(%arg0: i32) -> (i32, i32) {
    %c0_i32 = arith.constant 0 : i32
    %c0_i32_0 = arith.constant 0 : i32
    return %c0_i32, %arg0 : i32, i32
  }
}

</mosaic_0001>

<bundles_post_ra>
// kernel: tpu_custom_call.1
= control target key start
LH: loop header
LB: loop body
LE: loop exit
PB: predicated region body
PF: predicated region fallthrough
CT: control target
= control target key end

     0   :  { %vm103_vm0 = vcmask 1043456   ;;  %v3474_v3 = vmov 0   ;;  %vm93_vm1 = vcmask 64512   ;;  %s3466_s0 = inlined_call_operand.vmem [shape: f32[8,512], index: 0, kind: input, shape index: {}]   ;;  %s3467_s1 = inlined_call_operand.vmem [shape: bf16[48,8], index: 1, kind: input, shape index: {}]   ;;  %s3468_s2 = inlined_call_operand.vmem [shape: f32[48,1], index: 2, kind: input, shape index: {}]   ;;  %s3469_s3 = inlined_call_operand.vmem [shape: f32[48,9], index: 3, kind: input, shape index: {}]   ;;  %s3470_s4 = inlined_call_operand.vmem [shape: f32[48,1], index: 4, kind: input, shape index: {}]   ;;  %s3471_s5 = inlined_call_operand.vmem [shape: bf16[8,48], index: 5, kind: input, shape index: {}]   ;;  %s3472_s6 = inlined_call_operand.vmem [shape: f32[8,1], index: 6, kind: input, shape index: {}]   ;;  %s3473_s7 = inlined_call_operand.hbm [shape: f32[8,512], index: 7, kind: output, shape index: {}]  }
   0x1   :  { %v44_v0 = vld [vmem:[%s3468_s2 + $0x10] sm:$0xff]  ;;  %v29_v1 = vld [vmem:[%s3466_s0 + $0x8] sm:$0xff]  ;;  %v31_v2 = vld [vmem:[%s3466_s0 + $0x18] sm:$0xff]  ;;  %1691 = vset.pattern.permute.xlu1 %v3474_v3  ;;  %148 = vmatprep.mubr.bf16.mxu0 %v3474_v3 }
   0x2   :  { %v39_v4 = vpack.c.bf16 %v29_v1, %v29_v1  ;;  %v41_v5 = vpack.c.bf16 %v31_v2, %v31_v2  ;;  %v28_v6 = vld [vmem:[%s3466_s0] sm:$0xff]  ;;  %v30_v7 = vld [vmem:[%s3466_s0 + $0x10] sm:$0xff]  ;;  %60 = vperm.xlu1 %1691, %v44_v0   ;;  %211 = vmatprep.mubr.bf16.mxu1 %v3474_v3  ;;  %v45_v10 = vld [vmem:[%s3468_s2 + $0x18] sm:$0xff] }
   0x3   :  { %v38_v8 = vpack.c.bf16 %v28_v6, %v28_v6  ;;  %v40_v9 = vpack.c.bf16 %v30_v7, %v30_v7  ;;  %v1725_v13 = vld [vmem:[%s3467_s1] sm:$0xff]   ;;  %1690 = vset.pattern.permute.xlu0 %v3474_v3  ;;  %v47_v15 = vld [vmem:[%s3468_s2 + $0x28] sm:$0xff] }
   0x4   :  { %1653 = vmatprep.subr.msk.bf16.mxu0 %vm103_vm0, %v39_v4  ;;  %1657 = vmatprep.subr.msk.bf16.mxu1 %vm103_vm0, %v41_v5  ;;  %v42_v14 = vld [vmem:[%s3468_s2] sm:$0xff]  ;;  %v43_v16 = vld [vmem:[%s3468_s2 + $0x8] sm:$0xff] }
   0x5   :  { %v105_v11 = vsel %vm103_vm0, %v38_v8, 0  ;;  %v111_v12 = vsel %vm103_vm0, %v40_v9, 0  ;;  %50 = vperm.xlu0 %1690, %v42_v14  }
   0x6   :  { %131 = vmatpush1.bf16.msra.mxu0 %v105_v11  ;;  %194 = vmatpush1.bf16.msra.mxu1 %v111_v12 }
   0x7   :  { %65 = vperm.xlu1 %1691, %v45_v10  }
   0x9   :  { %1654 = vmatmul.mubr.msk.bf16.vlgmr.msra.gmra.mxu0 %vm93_vm1, %v1725_v13  ;;  %1658 = vmatmul.mubr.msk.bf16.vlgmr.msra.gmra.mxu1 %vm93_vm1, %v1725_v13 }
   0xa   :  { %12 = vsyncpa [#allocation3], 0  ;;  %158 = vmatprep.mubr.bf16.mxu0 %v3474_v3  ;;  %221 = vmatprep.mubr.bf16.mxu1 %v3474_v3  ;;  %v1854_v17 = vld [vmem:[%s3469_s3 + $0x20] sm:$0xff]  ;;  %v1726_v18 = vld [vmem:[%s3467_s1 + $0x8] sm:$0xff]   ;;  %v1755_v20 = vmov 1   ;;  %v1756_v23 = vmov 6  }
   0xb   :  { %75 = vperm.xlu1 %1691, %v47_v15   ;;  %55 = vperm.xlu0 %1690, %v43_v16   ;;  %v46_v19 = vld [vmem:[%s3468_s2 + $0x20] sm:$0xff]  ;;  %v1871_v21 = vld [vmem:[%s3469_s3 + $0x28] sm:$0xff]  ;;  %v1727_v22 = vld [vmem:[%s3467_s1 + $0x10] sm:$0xff]   ;;  %v1757_v26 = vmov 7   ;;  %v1758_v28 = vmov 2   ;;  %v1759_v30 = vmov 8  }
   0xc   :  { %v1882_v24 = vld [vmem:[%s3469_s3 + $0x18] sm:$0xff]  ;;  %v1889_v25 = vld [vmem:[%s3469_s3 + $0x8] sm:$0xff]  ;;  %v1900_v27 = vld [vmem:[%s3469_s3 + $0x10] sm:$0xff]  ;;  %v3479_v31 = vmov 3   ;;  %v3476_v33 = vmov 4   ;;  %v3477_v36 = vmov 5  }
   0xd   :  { %v1907_v29 = vld [vmem:[%s3469_s3] sm:$0xff]  ;;  %s1763_s3 = smov 1   ;;  %s1764_s14 = smov 127  }
   0xe   :  { %s1766_s23 = smov 16   ;;  %s1767_s24 = smov 112  }
   0xf   :  { %637 = vperm.xlu1 %1691, %v1854_v17   ;;  %70 = vperm.xlu0 %1690, %v46_v19   ;;  %s1768_s30 = smov [#allocation2]  }
  0x10   :  { %s1642_s8 = sshll.u32 %s1768_s30, 4  ;;  %s1643_s8 = int_to_ptr.vmem [resolvable:$true] %s1642_s8 }
  0x11   :  { %1655 = vmatmul.mubr.msk.bf16.gmra.mxu0 %vm93_vm1, %v1726_v18  ;;  %1659 = vmatmul.mubr.msk.bf16.gmra.mxu1 %vm93_vm1, %v1726_v18  ;;  %p1737_p1 = scmp.lt.s32.totalorder %s1643_s8, %s1643_s8 }
  0x12   :  { %168 = vmatprep.mubr.bf16.mxu0 %v3474_v3  ;;  %231 = vmatprep.mubr.bf16.mxu1 %v3474_v3 }
  0x13   :  { %1692 = vset.pattern.permute.xlu1 %v1755_v20  ;;  %1693 = vset.pattern.permute.xlu0 %v1755_v20 }
  0x14   :  { %686 = vperm.xlu1 %1692, %v1854_v17   ;;  %690 = vperm.xlu0 %1693, %v1871_v21  }
  0x18   :  { %1694 = vset.pattern.permute.xlu1 %v1756_v23  ;;  %682 = vperm.xlu0 %1693, %v1882_v24  }
  0x19   :  { %1656 = vmatmul.mubr.msk.bf16.gmra.mxu0 %vm93_vm1, %v1727_v22  ;;  %1660 = vmatmul.mubr.msk.bf16.gmra.mxu1 %vm93_vm1, %v1727_v22 }
  0x1a   :  { %1022 = vperm.xlu1 %1694, %v1854_v17   ;;  %1578 = vmatprep.mubr.bf16.mxu0 %v3474_v3 }
  0x1b   :  { %1619 = vmatprep.mubr.bf16.mxu1 %v3474_v3 }
  0x1c   :  { %674 = vperm.xlu0 %1693, %v1889_v25  }
  0x1e   :  { %1026 = vperm.xlu1 %1694, %v1871_v21  }
  0x20   :  { %1706 = vset.pattern.permute.xlu0 %v1757_v26 }
  0x21   :  { %1070 = vperm.xlu0 %1706, %v1854_v17  }
  0x22   :  { %1695 = vset.pattern.permute.xlu1 %v1757_v26 }
  0x23   :  { %1074 = vperm.xlu1 %1695, %v1871_v21  }
  0x25   :  { %1062 = vperm.xlu0 %1706, %v1900_v27  }
  0x27   :  { %1696 = vset.pattern.permute.xlu1 %v1758_v28 }
  0x28   :  { %758 = vperm.xlu1 %1696, %v1854_v17  }
  0x29   :  { %1054 = vperm.xlu0 %1706, %v1907_v29  }
  0x2c   :  { %1697 = vset.pattern.permute.xlu1 %v1759_v30 }
  0x2d   :  { %1142 = vperm.xlu1 %1697, %v1854_v17   ;;  %1708 = vset.pattern.permute.xlu0 %v1758_v28 }
  0x2e   :  { %762 = vperm.xlu0 %1708, %v1871_v21  }
  0x31   :  { %1146 = vperm.xlu1 %1697, %v1871_v21  }
  0x32   :  { %754 = vperm.xlu0 %1708, %v1882_v24  }
  0x35   :  { %1698 = vset.pattern.permute.xlu1 %v3474_v3 }
  0x36   :  { %632 = vperm.xlu1 %1698, %v1882_v24   ;;  %746 = vperm.xlu0 %1708, %v1889_v25  }
  0x3a   :  { %1699 = vset.pattern.permute.xlu1 %v1755_v20  ;;  %1713 = vset.pattern.permute.xlu0 %v3479_v31 }
  0x3b   :  { %678 = vperm.xlu1 %1699, %v1900_v27   ;;  %834 = vperm.xlu0 %1713, %v1871_v21  }
  0x3f   :  { %1700 = vset.pattern.permute.xlu1 %v1756_v23  ;;  %826 = vperm.xlu0 %1713, %v1882_v24  }
  0x40   :  { %1014 = vperm.xlu1 %1700, %v1900_v27  }
  0x44   :  { %1018 = vperm.xlu1 %1700, %v1882_v24  }
  0x48   :  { %1701 = vset.pattern.permute.xlu1 %v1757_v26 }
  0x49   :  { %1066 = vperm.xlu1 %1701, %v1882_v24  }
  0x4d   :  { %1702 = vset.pattern.permute.xlu1 %v1758_v28 }
  0x4e   :  { %750 = vperm.xlu1 %1702, %v1900_v27  }
  0x52   :  { %1703 = vset.pattern.permute.xlu1 %v1759_v30 }
  0x53   :  { %1134 = vperm.xlu1 %1703, %v1900_v27  }
  0x57   :  { %1138 = vperm.xlu1 %1703, %v1882_v24  }
  0x5b   :  { %1704 = vset.pattern.permute.xlu1 %v3474_v3 }
  0x5c   :  { %622 = vperm.xlu1 %1704, %v1889_v25  }
  0x60   :  { %1705 = vset.pattern.permute.xlu1 %v1755_v20 }
  0x61   :  { %670 = vperm.xlu1 %1705, %v1907_v29  }
  0x65   :  { %1707 = vset.pattern.permute.xlu1 %v1756_v23 }
  0x66   :  { %1006 = vperm.xlu1 %1707, %v1907_v29  }
  0x6a   :  { %1010 = vperm.xlu1 %1707, %v1889_v25  }
  0x6e   :  { %1709 = vset.pattern.permute.xlu1 %v1757_v26 }
  0x6f   :  { %1058 = vperm.xlu1 %1709, %v1889_v25  }
  0x73   :  { %1710 = vset.pattern.permute.xlu1 %v1758_v28 }
  0x74   :  { %742 = vperm.xlu1 %1710, %v1907_v29  }
  0x78   :  { %1711 = vset.pattern.permute.xlu1 %v1759_v30 }
  0x79   :  { %1126 = vperm.xlu1 %1711, %v1907_v29  }
  0x7d   :  { %1130 = vperm.xlu1 %1711, %v1889_v25   ;;  %v1936_v32 = vpop.permute.xlu1 %60 }
  0x80   :  { %v51_v46 = vpop.permute.xlu0 %50 }
  0x81   :  { %1712 = vset.pattern.permute.xlu1 %v3479_v31 }
  0x82   :  { %830 = vperm.xlu1 %1712, %v1854_v17   ;;  %v1941_v34 = vpop.permute.xlu1 %65 }
  0x86   :  { %1714 = vset.pattern.permute.xlu1 %v3476_v33  ;;  %v1945_v35 = vpop.permute.xlu1 %75  ;;  %v56_v56 = vpop.permute.xlu0 %55 }
  0x87   :  { %878 = vperm.xlu1 %1714, %v1854_v17  }
  0x8a   :  { %v1949_v37 = vpop.permute.xlu1 %637 }
  0x8b   :  { %882 = vperm.xlu1 %1714, %v1871_v21   ;;  %3614 = vst [vmem:[#allocation5_spill] sm:$0xff] %v1949_v37 }
  0x8f   :  { %1715 = vset.pattern.permute.xlu1 %v3477_v36  ;;  %v1953_v38 = vpop.permute.xlu1 %686 }
  0x90   :  { %954 = vperm.xlu1 %1715, %v1871_v21  }
  0x94   :  { %1716 = vset.pattern.permute.xlu1 %v3479_v31 }
  0x95   :  { %822 = vperm.xlu1 %1716, %v1900_v27   ;;  %v1958_v39 = vpop.permute.xlu1 %1022 }
  0x96   :  { %3615 = vst [vmem:[#allocation6_spill] sm:$0xff] %v1958_v39 }
  0x99   :  { %1717 = vset.pattern.permute.xlu1 %v3476_v33  ;;  %v1961_v40 = vpop.permute.xlu1 %1026 }
  0x9a   :  { %870 = vperm.xlu1 %1717, %v1900_v27   ;;  %3616 = vst [vmem:[#allocation7_spill] sm:$0xff] %v1961_v40 }
  0x9e   :  { %874 = vperm.xlu1 %1717, %v1882_v24   ;;  %v1963_v41 = vpop.permute.xlu1 %1074 }
  0x9f   :  { %3617 = vst [vmem:[#allocation8_spill] sm:$0xff] %v1963_v41 }
  0xa2   :  { %1718 = vset.pattern.permute.xlu1 %v3477_v36 }
  0xa3   :  { %v1965_v42 = vpop.permute.xlu1 %758 }
  0xa4   :  { %3618 = vst [vmem:[#allocation9_spill] sm:$0xff] %v1965_v42 }
  0xa8   :  { %v1967_v43 = vpop.permute.xlu1 %1142 }
  0xa9   :  { %3619 = vst [vmem:[#allocation10_spill] sm:$0xff] %v1967_v43 }
  0xac   :  { %v1969_v44 = vpop.permute.xlu1 %1146 }
  0xad   :  { %3620 = vst [vmem:[#allocation11_spill] sm:$0xff] %v1969_v44 }
  0xb1   :  { %v1971_v45 = vpop.permute.xlu1 %632 }
  0xb2   :  { %3621 = vst [vmem:[#allocation12_spill] sm:$0xff] %v1971_v45 }
  0xb6   :  { %v1973_v47 = vpop.permute.xlu1 %678 }
  0xb7   :  { %3622 = vst [vmem:[#allocation13_spill] sm:$0xff] %v1973_v47 }
  0xbb   :  { %v1979_v58 = vpop.permute.xlu1 %1014 }
  0xbf   :  { %v1989_v63 = vpop.permute.xlu1 %1018 }
  0xc0   :  { %3626 = vst [vmem:[#allocation17_spill] sm:$0xff] %v1989_v63 }
  0xc4   :  { %v1999_v4 = vpop.permute.xlu1 %1066 }
  0xc5   :  { %3628 = vst [vmem:[#allocation19_spill] sm:$0xff] %v1999_v4 }
  0xc9   :  { %v150_v48 = vpop.f32.mrf.mxu0  ;;  %v213_v49 = vpop.f32.mrf.mxu1 }
  0xca   :  { %v151_v50 = vadd.f32 %v150_v48, %v51_v46  ;;  %v214_v54 = vadd.f32 %v213_v49, %v51_v46  ;;  %v2011_v11 = vpop.permute.xlu1 %750 }
  0xcb   :  { %v152_v51 = vpop.f32.mrf.mxu0  ;;  %v215_v52 = vpop.f32.mrf.mxu1  ;;  %3631 = vst [vmem:[#allocation22_spill] sm:$0xff] %v2011_v11 }
  0xcc   :  { %v1975_v53 = vmax.f32 %v151_v50, 0.0  ;;  %v1981_v60 = vmax.f32 %v214_v54, 0.0  ;;  %v153_v1 = vadd.f32 %v152_v51, %v51_v46  ;;  %v216_v6 = vadd.f32 %v215_v52, %v51_v46 }
  0xcd   :  { %v154_v55 = vpop.f32.mrf.mxu0  ;;  %v217_v57 = vpop.f32.mrf.mxu1 }
  0xce   :  { %3623 = vst [vmem:[#allocation14_spill] sm:$0xff] %v1975_v53  ;;  %421 = vrot.lane.b32.xlu0 %v1975_v53, %s1763_s3  ;;  %v155_v59 = vadd.f32 %v154_v55, %v56_v56  ;;  %3624 = vst [vmem:[#allocation15_spill] sm:$0xff] %v1981_v60  ;;  %v218_v62 = vadd.f32 %v217_v57, %v56_v56  ;;  %v2003_v5 = vmax.f32 %v153_v1, 0.0  ;;  %v2009_v10 = vmax.f32 %v216_v6, 0.0  ;;  %v2023_v20 = vpop.permute.xlu1 %1134  ;;  %v2059_v55 = vpop.permute.xlu0 %70 }
  0xcf   :  { %v156_v2 = vpop.f32.mrf.mxu0  ;;  %v219_v8 = vpop.f32.mrf.mxu1 }
  0xd0   :  { %v1983_v61 = vmax.f32 %v155_v59, 0.0  ;;  %v1991_v0 = vmax.f32 %v218_v62, 0.0  ;;  %3629 = vst [vmem:[#allocation20_spill] sm:$0xff] %v2003_v5  ;;  %v157_v7 = vadd.f32 %v156_v2, %v56_v56  ;;  %3630 = vst [vmem:[#allocation21_spill] sm:$0xff] %v2009_v10  ;;  %v220_v13 = vadd.f32 %v219_v8, %v56_v56 }
  0xd1   :  { %v160_v9 = vpop.f32.mrf.mxu0  ;;  %v223_v14 = vpop.f32.mrf.mxu1 }
  0xd2   :  { %3625 = vst [vmem:[#allocation16_spill] sm:$0xff] %v1983_v61  ;;  %445 = vrot.lane.b32.xlu0 %v1981_v60, %s1763_s3  ;;  %423 = vrot.lane.b32.xlu1 %v1983_v61, %s1763_s3  ;;  %3627 = vst [vmem:[#allocation18_spill] sm:$0xff] %v1991_v0  ;;  %v2013_v12 = vmax.f32 %v157_v7, 0.0  ;;  %v2019_v16 = vmax.f32 %v220_v13, 0.0  ;;  %v161_v23 = vadd.f32 %v160_v9, %v1936_v32  ;;  %v2036_v46 = vpop.permute.xlu1 %1138  ;;  %v2076_v7 = vpop.permute.xlu0 %690 }
  0xd3   :  { %v162_v15 = vpop.f32.mrf.mxu0  ;;  %v225_v18 = vpop.f32.mrf.mxu1  ;;  %3635 = vst [vmem:[#allocation26_spill] sm:$0xff] %v2036_v46  ;;  %v224_v50 = vadd.f32 %v223_v14, %v1936_v32  ;;  %3642 = vst [vmem:[#allocation33_spill] sm:$0xff] %v2076_v7 }
  0xd4   :  { %3632 = vst [vmem:[#allocation23_spill] sm:$0xff] %v2013_v12  ;;  %3633 = vst [vmem:[#allocation24_spill] sm:$0xff] %v2019_v16  ;;  %v2038_v48 = vmax.f32 %v161_v23, 0.0  ;;  %v163_v59 = vadd.f32 %v162_v15, %v1936_v32  ;;  %v226_v9 = vadd.f32 %v225_v18, %v1936_v32 }
  0xd5   :  { %v164_v19 = vpop.f32.mrf.mxu0  ;;  %v227_v26 = vpop.f32.mrf.mxu1  ;;  %v2053_v52 = vmax.f32 %v224_v50, 0.0 }
  0xd6   :  { %518 = vrot.lane.b32.xlu0 %v1975_v53, %s1764_s14  ;;  %447 = vrot.lane.b32.xlu1 %v1991_v0, %s1763_s3  ;;  %v165_v22 = vadd.f32 %v164_v19, %v1941_v34  ;;  %v228_v30 = vadd.f32 %v227_v26, %v1941_v34  ;;  %3636 = vst [vmem:[#allocation27_spill] sm:$0xff] %v2038_v48  ;;  %v2080_v8 = vmax.f32 %v163_v59, 0.0  ;;  %v2091_v15 = vmax.f32 %v226_v9, 0.0  ;;  %v2093_v19 = vpop.permute.xlu0 %682 }
  0xd7   :  { %v2049_v51 = vpop.permute.xlu1 %622  ;;  %3638 = vst [vmem:[#allocation29_spill] sm:$0xff] %v2053_v52  ;;  %v166_v54 = vpop.f32.mrf.mxu0  ;;  %3647 = vst [vmem:[#allocation38_spill] sm:$0xff] %v2093_v19 }
  0xd8   :  { %v2031_v28 = vmax.f32 %v165_v22, 0.0  ;;  %v2042_v49 = vmax.f32 %v228_v30, 0.0  ;;  %v167_v56 = vadd.f32 %v166_v54, %v1941_v34  ;;  %v229_v62 = vpop.f32.mrf.mxu1  ;;  %3643 = vst [vmem:[#allocation34_spill] sm:$0xff] %v2080_v8  ;;  %3646 = vst [vmem:[#allocation37_spill] sm:$0xff] %v2091_v15 }
  0xd9   :  { %v230_v2 = vadd.f32 %v229_v62, %v1941_v34  ;;  %v170_v14 = vpop.f32.mrf.mxu0 }
  0xda   :  { %542 = vrot.lane.b32.xlu0 %v1981_v60, %s1764_s14  ;;  %520 = vrot.lane.b32.xlu1 %v1983_v61, %s1764_s14  ;;  %3634 = vst [vmem:[#allocation25_spill] sm:$0xff] %v2031_v28  ;;  %3637 = vst [vmem:[#allocation28_spill] sm:$0xff] %v2042_v49  ;;  %v2069_v1 = vmax.f32 %v167_v56, 0.0  ;;  %v233_v22 = vpop.f32.mrf.mxu1  ;;  %v2106_v50 = vpop.permute.xlu0 %674  ;;  %v171_v54 = vadd.f32 %v170_v14, %v2059_v55 }
  0xdb   :  { %v2083_v13 = vmax.f32 %v230_v2, 0.0  ;;  %v172_v23 = vpop.f32.mrf.mxu0 }
  0xdc   :  { %v2062_v57 = vpop.permute.xlu1 %670  ;;  %3640 = vst [vmem:[#allocation31_spill] sm:$0xff] %v2069_v1  ;;  %v235_v30 = vpop.f32.mrf.mxu1  ;;  %v2118_v9 = vmax.f32 %v171_v54, 0.0 }
  0xdd   :  { %3639 = vst [vmem:[#allocation30_spill] sm:$0xff] %v2062_v57  ;;  %3644 = vst [vmem:[#allocation35_spill] sm:$0xff] %v2083_v13  ;;  %v174_v32 = vpop.f32.mrf.mxu0  ;;  %v236_v46 = vadd.f32 %v235_v30, %v2059_v55 }
  0xde   :  { %433 = vrot.lane.b32.xlu0 %v2003_v5, %s1763_s3  ;;  %544 = vrot.lane.b32.xlu1 %v1991_v0, %s1764_s14  ;;  %v175_v26 = vadd.f32 %v174_v32, %v1945_v35  ;;  %v237_v56 = vpop.f32.mrf.mxu1  ;;  %v234_v32 = vadd.f32 %v233_v22, %v2059_v55  ;;  %v2123_v14 = vpop.permute.xlu0 %1070 }
  0xdf   :  { %v238_v62 = vadd.f32 %v237_v56, %v1945_v35  ;;  %v176_v33 = vpop.f32.mrf.mxu0 }
  0xe0   :  { %v2109_v59 = vmax.f32 %v175_v26, 0.0  ;;  %v2131_v56 = vmax.f32 %v234_v32, 0.0  ;;  %v177_v54 = vadd.f32 %v176_v33, %v1945_v35  ;;  %v239_v36 = vpop.f32.mrf.mxu1  ;;  %v173_v32 = vadd.f32 %v172_v23, %v2059_v55 }
  0xe1   :  { %v2072_v6 = vpop.permute.xlu1 %1006  ;;  %v2121_v3 = vmax.f32 %v238_v62, 0.0  ;;  %v240_v44 = vadd.f32 %v239_v36, %v1945_v35  ;;  %v2169_v36 = vmax.f32 %v236_v46, 0.0 }
  0xe2   :  { %457 = vrot.lane.b32.xlu0 %v2009_v10, %s1763_s3  ;;  %435 = vrot.lane.b32.xlu1 %v2013_v12, %s1763_s3  ;;  %3641 = vst [vmem:[#allocation32_spill] sm:$0xff] %v2072_v6  ;;  %3649 = vst [vmem:[#allocation40_spill] sm:$0xff] %v2109_v59  ;;  %v2137_v22 = vpop.permute.xlu0 %1062  ;;  %v2147_v31 = vmax.f32 %v177_v54, 0.0  ;;  %v2158_v40 = vmax.f32 %v173_v32, 0.0  ;;  %v3661_v54 = vmov 3  }
  0xe3   :  { %3651 = vst [vmem:[#allocation42_spill] sm:$0xff] %v2121_v3  ;;  %v2161_v4 = vmax.f32 %v240_v44, 0.0 }
  0xe4   :  { %3654 = vst [vmem:[#allocation45_spill] sm:$0xff] %v2147_v31 }
  0xe5   :  { %v2087_v34 = vpop.permute.xlu1 %1010  ;;  %3657 = vst [vmem:[#allocation48_spill] sm:$0xff] %v2161_v4 }
  0xe6   :  { %530 = vrot.lane.b32.xlu0 %v2003_v5, %s1764_s14  ;;  %459 = vrot.lane.b32.xlu1 %v2019_v16, %s1763_s3  ;;  %3645 = vst [vmem:[#allocation36_spill] sm:$0xff] %v2087_v34  ;;  %v2150_v41 = vpop.permute.xlu0 %1054 }
  0xe7   :  { %3655 = vst [vmem:[#allocation46_spill] sm:$0xff] %v2150_v41  ;;  %v3665_v41 = vmov 4  }
  0xea   :  { %554 = vrot.lane.b32.xlu0 %v2009_v10, %s1764_s14  ;;  %532 = vrot.lane.b32.xlu1 %v2013_v12, %s1764_s14  ;;  %v2099_v18 = vpop.permute.xlu1 %1058  ;;  %v2165_v35 = vpop.permute.xlu0 %762 }
  0xeb   :  { %3648 = vst [vmem:[#allocation39_spill] sm:$0xff] %v2099_v18  ;;  %3658 = vst [vmem:[#allocation49_spill] sm:$0xff] %v2165_v35 }
  0xee   :  { %556 = vrot.lane.b32.xlu0 %v2019_v16, %s1764_s14  ;;  %427 = vrot.lane.b32.xlu1 %v2031_v28, %s1763_s3  ;;  %v2177_v44 = vpop.permute.xlu0 %754 }
  0xef   :  { %v2112_v2 = vpop.permute.xlu1 %742  ;;  %3659 = vst [vmem:[#allocation50_spill] sm:$0xff] %v2177_v44 }
  0xf0   :  { %3650 = vst [vmem:[#allocation41_spill] sm:$0xff] %v2112_v2  ;;  %v1443_v2 = vld [vmem:[%s3470_s4 + $0x20] sm:$0xff] }
  0xf2   :  { %425 = vrot.lane.b32.xlu0 %v2038_v48, %s1763_s3  ;;  %451 = vrot.lane.b32.xlu1 %v2042_v49, %s1763_s3  ;;  %v2187_v46 = vpop.permute.xlu0 %746 }
  0xf4   :  { %v2127_v26 = vpop.permute.xlu1 %1126 }
  0xf5   :  { %3652 = vst [vmem:[#allocation43_spill] sm:$0xff] %v2127_v26  ;;  %v3664_v26 = vmov 5  }
  0xf6   :  { %449 = vrot.lane.b32.xlu0 %v2053_v52, %s1763_s3  ;;  %524 = vrot.lane.b32.xlu1 %v2031_v28, %s1764_s14  ;;  %v2195_v32 = vpop.permute.xlu0 %834 }
  0xf7   :  { %3662 = vst [vmem:[#allocation52_spill] sm:$0xff] %v2195_v32 }
  0xf8   :  { %v2140_v62 = vpop.permute.xlu1 %1130 }
  0xf9   :  { %3653 = vst [vmem:[#allocation44_spill] sm:$0xff] %v2140_v62 }
  0xfa   :  { %522 = vrot.lane.b32.xlu0 %v2038_v48, %s1764_s14  ;;  %548 = vrot.lane.b32.xlu1 %v2042_v49, %s1764_s14  ;;  %v2203_v63 = vpop.permute.xlu0 %826 }
  0xfd   :  { %v2154_v33 = vpop.permute.xlu1 %830 }
  0xfe   :  { %546 = vrot.lane.b32.xlu0 %v2053_v52, %s1764_s14  ;;  %439 = vrot.lane.b32.xlu1 %v2069_v1, %s1763_s3  ;;  %3656 = vst [vmem:[#allocation47_spill] sm:$0xff] %v2154_v33 }
 0x102   :  { %437 = vrot.lane.b32.xlu0 %v2080_v8, %s1763_s3  ;;  %463 = vrot.lane.b32.xlu1 %v2083_v13, %s1763_s3  ;;  %v2171_v23 = vpop.permute.xlu1 %878 }
 0x106   :  { %461 = vrot.lane.b32.xlu0 %v2091_v15, %s1763_s3  ;;  %536 = vrot.lane.b32.xlu1 %v2069_v1, %s1764_s14  ;;  %v2181_v55 = vpop.permute.xlu1 %882 }
 0x10a   :  { %534 = vrot.lane.b32.xlu0 %v2080_v8, %s1764_s14  ;;  %560 = vrot.lane.b32.xlu1 %v2083_v13, %s1764_s14 }
 0x10b   :  { %v2189_v30 = vpop.permute.xlu1 %954 }
 0x10c   :  { %3660 = vst [vmem:[#allocation51_spill] sm:$0xff] %v2189_v30 }
 0x10e   :  { %558 = vrot.lane.b32.xlu0 %v2091_v15, %s1764_s14  ;;  %431 = vrot.lane.b32.xlu1 %v2109_v59, %s1763_s3 }
 0x110   :  { %v2197_v35 = vpop.permute.xlu1 %822 }
 0x111   :  { %3663 = vst [vmem:[#allocation53_spill] sm:$0xff] %v2197_v35 }
 0x112   :  { %429 = vrot.lane.b32.xlu0 %v2118_v9, %s1763_s3  ;;  %455 = vrot.lane.b32.xlu1 %v2121_v3, %s1763_s3 }
 0x116   :  { %453 = vrot.lane.b32.xlu0 %v2131_v56, %s1763_s3  ;;  %528 = vrot.lane.b32.xlu1 %v2109_v59, %s1764_s14 }
 0x11a   :  { %526 = vrot.lane.b32.xlu0 %v2118_v9, %s1764_s14  ;;  %552 = vrot.lane.b32.xlu1 %v2121_v3, %s1764_s14 }
 0x11e   :  { %550 = vrot.lane.b32.xlu0 %v2131_v56, %s1764_s14  ;;  %443 = vrot.lane.b32.xlu1 %v2147_v31, %s1763_s3 }
 0x122   :  { %441 = vrot.lane.b32.xlu0 %v2158_v40, %s1763_s3  ;;  %467 = vrot.lane.b32.xlu1 %v2161_v4, %s1763_s3 }
 0x126   :  { %465 = vrot.lane.b32.xlu0 %v2169_v36, %s1763_s3  ;;  %540 = vrot.lane.b32.xlu1 %v2147_v31, %s1764_s14 }
 0x12a   :  { %538 = vrot.lane.b32.xlu0 %v2158_v40, %s1764_s14  ;;  %564 = vrot.lane.b32.xlu1 %v2161_v4, %s1764_s14 }
 0x12e   :  { %562 = vrot.lane.b32.xlu0 %v2169_v36, %s1764_s14  ;;  %946 = vperm.xlu1 %1718, %v1882_v24   ;;  %v2205_v24 = vpop.permute.xlu1 %870  ;;  %s1732_s14 = scalar_lea.vmem %s1643_s8, 512 }
 0x12f   :  { %3666 = vst [vmem:[#allocation54_spill] sm:$0xff] %v2205_v24  ;;  %v698_v24 = vmul.f32 %v2106_v50, %v2013_v12  ;;  %p1733_p0 = scmp.ne.s32.totalorder %s1643_s8, %s1732_s14  ;;  %p1738_p2 = scmp.lt.s32.totalorder %s1732_s14, %s1732_s14 }
 0x131   :  { %p1739_p3 = por %p1738_p2, %p1737_p1 }
 0x132   :  { %818 = vperm.xlu0 %1713, %v1889_v25   ;;  %1719 = vset.pattern.permute.xlu1 %v3661_v54  ;;  %v2212_v6 = vpop.permute.xlu1 %874 }
 0x133   :  { %814 = vperm.xlu1 %1719, %v1907_v29   ;;  %p1740_p4 = pnand %p1739_p3, %p1733_p0 }
 0x136   :  { %1720 = vset.pattern.permute.xlu0 %v3664_v26 }
 0x137   :  { %950 = vperm.xlu0 %1720, %v1854_v17   ;;  %1721 = vset.pattern.permute.xlu1 %v3665_v41  ;;  %v3668_v17 = vmov 0  }
 0x138   :  { %862 = vperm.xlu1 %1721, %v1907_v29  }
 0x13b   :  { %942 = vperm.xlu0 %1720, %v1900_v27  }
 0x13c   :  { %866 = vperm.xlu1 %1721, %v1889_v25  }
 0x13f   :  { %934 = vperm.xlu0 %1720, %v1907_v29  }
 0x140   :  { %v2210_v54 = vpop.permute.xlu0 %421  ;;  %1723 = vset.pattern.permute.xlu1 %v3664_v26 }
 0x141   :  { %3667 = vst [vmem:[#allocation55_spill] sm:$0xff] %v2210_v54  ;;  %938 = vperm.xlu1 %1723, %v1889_v25   ;;  %v1442_v25 = vld [vmem:[%s3470_s4 + $0x18] sm:$0xff]  ;;  %v3684_v54 = vmov 0.0  }
 0x143   :  { %1722 = vset.pattern.permute.xlu0 %v3668_v17 }
 0x144   :  { %642 = vperm.xlu0 %1722, %v1871_v21   ;;  %v2218_v41 = vpop.permute.xlu0 %445  ;;  %v424_v57 = vpop.permute.xlu1 %423  ;;  %v266_v21 = vlaneseq }
 0x145   :  { %3669 = vst [vmem:[#allocation56_spill] sm:$0xff] %v2218_v41  ;;  %1724 = vset.pattern.permute.xlu1 %v3668_v17 }
 0x146   :  { %1467 = vperm.xlu1 %1724, %v1443_v2   ;;  %v1444_v2 = vld [vmem:[%s3470_s4 + $0x28] sm:$0xff] }
 0x148   :  { %627 = vperm.xlu0 %1722, %v1900_v27   ;;  %v2225_v44 = vpop.permute.xlu0 %518  ;;  %v448_v26 = vpop.permute.xlu1 %447  ;;  %v2238_v27 = vand.u32 127, %v266_v21 }
 0x149   :  { %3670 = vst [vmem:[#allocation57_spill] sm:$0xff] %v2225_v44 }
 0x14a   :  { %1462 = vperm.xlu1 %1724, %v1442_v25   ;;  %v1441_v25 = vld [vmem:[%s3470_s4 + $0x10] sm:$0xff]  ;;  %v275_v47 = vand.u32 15, %v2238_v27  ;;  %v2252_v21 = vadd.s32 256, %v2238_v27  ;;  %vm469_vm3 = vcmp.lt.s32.totalorder %v2238_v27, 1  ;;  %v2259_v5 = vadd.s32 384, %v2238_v27 }
 0x14b   :  { %vm566_vm7 = vcmp.lt.s32.totalorder %v2238_v27, 127  ;;  %vm1245_vm12 = vcmp.lt.s32.totalorder %v2238_v27, 16  ;;  %vm1366_vm15 = vcmp.lt.s32.totalorder %v2238_v27, 112 }
 0x14c   :  { %617 = vperm.xlu0 %1722, %v1907_v29   ;;  %v2231_v11 = vpop.permute.xlu0 %542  ;;  %v2233_v45 = vpop.permute.xlu1 %520  ;;  %v2246_v29 = vadd.s32 128, %v2238_v27  ;;  %3675 = vst [vmem:[#allocation62_spill] sm:$0xff] %v2252_v21  ;;  %vm367_vm2 = vcmp.ne.s32.totalorder %v275_v47, 0  ;;  %3677 = vst [vmem:[#allocation64_spill] sm:$0xff] %v2259_v5  ;;  %v289_v30 = vand.u32 15, %v2252_v21  ;;  %vm379_vm5 = vcmp.ne.s32.totalorder %v275_v47, 15 }
 0x14d   :  { %3671 = vst [vmem:[#allocation58_spill] sm:$0xff] %v2231_v11  ;;  %v296_v37 = vand.u32 15, %v2259_v5 }
 0x14e   :  { %3673 = vst [vmem:[#allocation60_spill] sm:$0xff] %v2246_v29  ;;  %vm369_vm8 = vcmp.ne.s32.totalorder %v289_v30, 0  ;;  %vm381_vm9 = vcmp.ne.s32.totalorder %v289_v30, 15 }
 0x14f   :  { %vm370_vm10 = vcmp.ne.s32.totalorder %v296_v37, 0  ;;  %vm382_vm11 = vcmp.ne.s32.totalorder %v296_v37, 15 }
 0x150   :  { %1472 = vperm.xlu0 %1722, %v1444_v2   ;;  %v2240_v17 = vpop.permute.xlu0 %433  ;;  %v545_v19 = vpop.permute.xlu1 %544  ;;  %v282_v2 = vand.u32 15, %v2246_v29 }
 0x151   :  { %3672 = vst [vmem:[#allocation59_spill] sm:$0xff] %v2240_v17  ;;  %v2322_v17 = vsel %vm381_vm9, 1.0, %v3684_v54 }
 0x152   :  { %vm368_vm4 = vcmp.ne.s32.totalorder %v282_v2, 0  ;;  %vm380_vm6 = vcmp.ne.s32.totalorder %v282_v2, 15 }
 0x154   :  { %1457 = vperm.xlu0 %1722, %v1441_v25   ;;  %v2249_v7 = vpop.permute.xlu0 %457  ;;  %v436_v10 = vpop.permute.xlu1 %435  ;;  %v3523_v25 = vmov 0.0  }
 0x155   :  { %3674 = vst [vmem:[#allocation61_spill] sm:$0xff] %v2249_v7  ;;  %v2263_v43 = vsel %vm367_vm2, 1.0, %v3523_v25  ;;  %v483_v29 = vsel %vm469_vm3, %v424_v57, %v436_v10  ;;  %v2275_v21 = vsel %vm368_vm4, 1.0, %v3523_v25  ;;  %v2289_v2 = vsel %vm379_vm5, 1.0, %v3523_v25 }
 0x156   :  { %v2280_v32 = vmul.f32 %v2275_v21, %v483_v29  ;;  %v2292_v5 = vsel %vm380_vm6, 1.0, %v3523_v25  ;;  %v2306_v11 = vsel %vm369_vm8, 1.0, %v3523_v25  ;;  %vm1542_vm2 = vcmask 392192  }
 0x158   :  { %v2255_v60 = vpop.permute.xlu0 %530  ;;  %v460_v53 = vpop.permute.xlu1 %459  ;;  %3680 = vst [vmem:[#allocation67_spill] sm:$0xff] %v2280_v32 }
 0x159   :  { %3676 = vst [vmem:[#allocation63_spill] sm:$0xff] %v2255_v60  ;;  %v489_v42 = vsel %vm469_vm3, %v460_v53, %v424_v57  ;;  %v477_v57 = vsel %vm469_vm3, %v436_v10, %v448_v26  ;;  %v697_v10 = vmul.f32 %v2106_v50, %v1983_v61  ;;  %v471_v25 = vsel %vm469_vm3, %v448_v26, %v460_v53 }
 0x15a   :  { %v2270_v33 = vmul.f32 %v2263_v43, %v489_v42 }
 0x15c   :  { %3678 = vst [vmem:[#allocation65_spill] sm:$0xff] %v2270_v33  ;;  %v2272_v39 = vpop.permute.xlu0 %554  ;;  %v533_v35 = vpop.permute.xlu1 %532  ;;  %v649_v42 = vmul.f32 %v2049_v51, %v2270_v33 }
 0x15d   :  { %3679 = vst [vmem:[#allocation66_spill] sm:$0xff] %v2272_v39  ;;  %v574_v47 = vsel %vm566_vm7, %v533_v35, %v545_v19  ;;  %v580_v29 = vsel %vm566_vm7, %v2233_v45, %v533_v35 }
 0x15e   :  { %v2298_v39 = vmul.f32 %v2289_v2, %v580_v29  ;;  %v2301_v44 = vmul.f32 %v2292_v5, %v574_v47  ;;  %v2313_v29 = vmul.f32 %v2306_v11, %v477_v57  ;;  %v650_v47 = vmul.f32 %v2049_v51, %v2280_v32 }
 0x15f   :  { %v721_v41 = vadd.f32 %v697_v10, %v649_v42  ;;  %v2332_v42 = vsel %vm370_vm10, 1.0, %v3684_v54 }
 0x160   :  { %3681 = vst [vmem:[#allocation68_spill] sm:$0xff] %v2298_v39  ;;  %3682 = vst [vmem:[#allocation69_spill] sm:$0xff] %v2301_v44  ;;  %v557_v60 = vpop.permute.xlu0 %556  ;;  %v2308_v7 = vpop.permute.xlu1 %427  ;;  %v769_v30 = vmul.f32 %v2187_v46, %v2298_v39  ;;  %v651_v10 = vmul.f32 %v2049_v51, %v2313_v29  ;;  %v2340_v31 = vmul.f32 %v2332_v42, %v471_v25 }
 0x161   :  { %v568_v35 = vsel %vm566_vm7, %v545_v19, %v557_v60  ;;  %3683 = vst [vmem:[#allocation70_spill] sm:$0xff] %v2313_v29  ;;  %v770_v19 = vmul.f32 %v2187_v46, %v2301_v44  ;;  %v586_v53 = vsel %vm566_vm7, %v557_v60, %v2233_v45  ;;  %v722_v37 = vadd.f32 %v698_v24, %v650_v47 }
 0x162   :  { %v2329_v57 = vmul.f32 %v2322_v17, %v568_v35  ;;  %v793_v4 = vadd.f32 %v769_v30, %v721_v41  ;;  %3686 = vst [vmem:[#allocation72_spill] sm:$0xff] %v2340_v31  ;;  %v2344_v41 = vsel %vm382_vm11, 1.0, %v3684_v54  ;;  %v699_v29 = vmul.f32 %v2106_v50, %v1991_v0 }
 0x163   :  { %v2347_v35 = vmul.f32 %v2344_v41, %v586_v53  ;;  %v794_v60 = vadd.f32 %v770_v19, %v722_v37  ;;  %v700_v19 = vmul.f32 %v2106_v50, %v2019_v16  ;;  %v1034_v50 = vmul.f32 %v2087_v34, %v2280_v32 }
 0x164   :  { %3685 = vst [vmem:[#allocation71_spill] sm:$0xff] %v2329_v57  ;;  %v426_v3 = vpop.permute.xlu0 %425  ;;  %v452_v26 = vpop.permute.xlu1 %451  ;;  %1199 = vrot.lane.b32.xlu1 %v793_v4, %s1766_s23  ;;  %v771_v45 = vmul.f32 %v2187_v46, %v2329_v57  ;;  %v652_v4 = vmul.f32 %v2049_v51, %v2340_v31  ;;  %v723_v24 = vadd.f32 %v699_v29, %v651_v10 }
 0x165   :  { %3687 = vst [vmem:[#allocation73_spill] sm:$0xff] %v2347_v35  ;;  %v772_v47 = vmul.f32 %v2187_v46, %v2347_v35  ;;  %v1033_v57 = vmul.f32 %v2087_v34, %v2270_v33  ;;  %v1081_v29 = vmul.f32 %v2099_v18, %v1983_v61  ;;  %v1153_v46 = vmul.f32 %v2140_v62, %v2298_v39 }
 0x166   :  { %v795_v53 = vadd.f32 %v771_v45, %v723_v24  ;;  %v724_v51 = vadd.f32 %v700_v19, %v652_v4  ;;  %v1082_v35 = vmul.f32 %v2099_v18, %v2013_v12  ;;  %v1154_v4 = vmul.f32 %v2140_v62, %v2301_v44 }
 0x167   :  { %v1105_v24 = vadd.f32 %v1081_v29, %v1033_v57 }
 0x168   :  { %v450_v30 = vpop.permute.xlu0 %449  ;;  %v2353_v25 = vpop.permute.xlu1 %524  ;;  %1211 = vrot.lane.b32.xlu1 %v794_v60, %s1766_s23  ;;  %v796_v10 = vadd.f32 %v772_v47, %v724_v51  ;;  %v1106_v47 = vadd.f32 %v1082_v35, %v1034_v50 }
 0x16a   :  { %v1178_v34 = vadd.f32 %v1154_v4, %v1106_v47 }
 0x16c   :  { %v2360_v54 = vpop.permute.xlu0 %522  ;;  %v2364_v37 = vpop.permute.xlu1 %548  ;;  %1223 = vrot.lane.b32.xlu1 %v795_v53, %s1766_s23  ;;  %v1177_v53 = vadd.f32 %v1153_v46, %v1105_v24 }
 0x170   :  { %v547_v45 = vpop.permute.xlu0 %546  ;;  %v440_v60 = vpop.permute.xlu1 %439  ;;  %1235 = vrot.lane.b32.xlu1 %v796_v10, %s1766_s23 }
 0x171   :  { %v485_v50 = vsel %vm469_vm3, %v2308_v7, %v440_v60 }
 0x174   :  { %v438_v19 = vpop.permute.xlu0 %437  ;;  %v464_v16 = vpop.permute.xlu1 %463  ;;  %1320 = vrot.lane.b32.xlu1 %v1177_v53, %s1767_s24  ;;  %v1087_v53 = vmul.f32 %v2137_v22, %v2053_v52 }
 0x175   :  { %v478_v51 = vsel %vm469_vm3, %v438_v19, %v450_v30  ;;  %v484_v29 = vsel %vm469_vm3, %v426_v3, %v438_v19  ;;  %v473_v4 = vsel %vm469_vm3, %v452_v26, %v464_v16  ;;  %v479_v19 = vsel %vm469_vm3, %v440_v60, %v452_v26 }
 0x176   :  { %v2415_v62 = vmul.f32 %v2306_v11, %v478_v51  ;;  %v2428_v60 = vmul.f32 %v2275_v21, %v485_v50  ;;  %v1085_v51 = vmul.f32 %v2137_v22, %v2038_v48  ;;  %v2442_v44 = vmul.f32 %v2306_v11, %v479_v19 }
 0x178   :  { %v462_v39 = vpop.permute.xlu0 %461  ;;  %v2383_v10 = vpop.permute.xlu1 %536  ;;  %1332 = vrot.lane.b32.xlu1 %v1178_v34, %s1767_s24  ;;  %v1086_v34 = vmul.f32 %v2137_v22, %v2080_v8  ;;  %3691 = vst [vmem:[#allocation77_spill] sm:$0xff] %v2415_v62  ;;  %3693 = vst [vmem:[#allocation79_spill] sm:$0xff] %v2428_v60  ;;  %v1039_v19 = vmul.f32 %v1979_v58, %v2415_v62 }
 0x179   :  { %v472_v24 = vsel %vm469_vm3, %v450_v30, %v462_v39  ;;  %v490_v35 = vsel %vm469_vm3, %v462_v39, %v426_v3  ;;  %v491_v3 = vsel %vm469_vm3, %v464_v16, %v2308_v7  ;;  %v2409_v39 = vmul.f32 %v2275_v21, %v484_v29  ;;  %3695 = vst [vmem:[#allocation81_spill] sm:$0xff] %v2442_v44 }
 0x17a   :  { %v2412_v30 = vmul.f32 %v2263_v43, %v490_v35  ;;  %v2418_v18 = vmul.f32 %v2332_v42, %v472_v24  ;;  %v2431_v29 = vmul.f32 %v2332_v42, %v473_v4  ;;  %v1088_v24 = vmul.f32 %v2137_v22, %v2091_v15 }
 0x17b   :  { %3689 = vst [vmem:[#allocation75_spill] sm:$0xff] %v2409_v39  ;;  %v897_v35 = vmul.f32 %v2212_v6, %v2031_v28  ;;  %v2445_v50 = vmul.f32 %v2263_v43, %v491_v3  ;;  %v1038_v4 = vmul.f32 %v1979_v58, %v2409_v39 }
 0x17c   :  { %v535_v57 = vpop.permute.xlu0 %534  ;;  %v2388_v46 = vpop.permute.xlu1 %560  ;;  %3690 = vst [vmem:[#allocation76_spill] sm:$0xff] %v2412_v30  ;;  %3692 = vst [vmem:[#allocation78_spill] sm:$0xff] %v2418_v18  ;;  %v1037_v0 = vmul.f32 %v1979_v58, %v2412_v30  ;;  %v1040_v3 = vmul.f32 %v1979_v58, %v2418_v18  ;;  %v852_v31 = vmul.f32 %v2203_v63, %v2431_v29 }
 0x17d   :  { %3688 = vst [vmem:[#allocation74_spill] sm:$0xff] %v2388_v46  ;;  %v575_v26 = vsel %vm566_vm7, %v535_v57, %v547_v45  ;;  %v581_v16 = vsel %vm566_vm7, %v2360_v54, %v535_v57  ;;  %3694 = vst [vmem:[#allocation80_spill] sm:$0xff] %v2431_v29  ;;  %v898_v57 = vmul.f32 %v2212_v6, %v2069_v1 }
 0x17e   :  { %3696 = vst [vmem:[#allocation82_spill] sm:$0xff] %v2445_v50  ;;  %v2452_v22 = vmul.f32 %v2289_v2, %v581_v16  ;;  %v2455_v28 = vmul.f32 %v2292_v5, %v575_v26  ;;  %v850_v26 = vmul.f32 %v2203_v63, %v2428_v60  ;;  %v899_v29 = vmul.f32 %v2212_v6, %v2042_v49 }
 0x17f   :  { %v1110_v33 = vadd.f32 %v1086_v34, %v1038_v4  ;;  %v1112_v46 = vadd.f32 %v1088_v24, %v1040_v3  ;;  %v2558_v4 = vmul.f32 %v2171_v23, %v2158_v40  ;;  %v3708_v3 = vld [vmem:[#allocation42_spill] sm:$0xff] }
 0x180   :  { %v559_v47 = vpop.permute.xlu0 %558  ;;  %v2425_v7 = vpop.permute.xlu1 %431  ;;  %3697 = vst [vmem:[#allocation83_spill] sm:$0xff] %v2452_v22  ;;  %3698 = vst [vmem:[#allocation84_spill] sm:$0xff] %v2455_v28  ;;  %v1157_v32 = vmul.f32 %v2023_v20, %v2452_v22  ;;  %v1158_v58 = vmul.f32 %v2023_v20, %v2455_v28  ;;  %v900_v22 = vmul.f32 %v2212_v6, %v2083_v13 }
 0x181   :  { %v569_v1 = vsel %vm566_vm7, %v547_v45, %v559_v47  ;;  %v587_v61 = vsel %vm566_vm7, %v559_v47, %v2360_v54  ;;  %v851_v45 = vmul.f32 %v2203_v63, %v2442_v44  ;;  %v849_v54 = vmul.f32 %v2203_v63, %v2445_v50 }
 0x182   :  { %v2483_v47 = vmul.f32 %v2322_v17, %v569_v1  ;;  %v2486_v60 = vmul.f32 %v2344_v41, %v587_v61  ;;  %v1109_v28 = vadd.f32 %v1085_v51, %v1037_v0  ;;  %v1111_v44 = vadd.f32 %v1087_v53, %v1039_v19  ;;  %v3707_v19 = vld [vmem:[#allocation45_spill] sm:$0xff] }
 0x183   :  { %v2502_v49 = vadd.f32 %v1158_v58, %v1110_v33  ;;  %v2504_v18 = vadd.f32 %v898_v57, %v850_v26  ;;  %v2506_v6 = vadd.f32 %v900_v22, %v852_v31  ;;  %v2512_v53 = vadd.f32 %v897_v35, %v849_v54  ;;  %v3709_v26 = vld [vmem:[#allocation48_spill] sm:$0xff] }
 0x184   :  { %v2457_v12 = vpop.permute.xlu0 %429  ;;  %v2468_v16 = vpop.permute.xlu1 %455  ;;  %3699 = vst [vmem:[#allocation85_spill] sm:$0xff] %v2483_v47  ;;  %3700 = vst [vmem:[#allocation86_spill] sm:$0xff] %v2486_v60  ;;  %v1159_v63 = vmul.f32 %v2023_v20, %v2483_v47  ;;  %v1160_v1 = vmul.f32 %v2023_v20, %v2486_v60  ;;  %v2500_v50 = vadd.f32 %v1157_v32, %v1109_v28 }
 0x185   :  { %3702 = vst [vmem:[#allocation88_spill] sm:$0xff] %v2502_v49  ;;  %v2514_v51 = vadd.f32 %v899_v29, %v851_v45  ;;  %v2522_v28 = vmul.f32 %v1953_v38, %v2158_v40  ;;  %v2526_v31 = vmul.f32 %v1953_v38, %v2131_v56  ;;  %v2530_v33 = vmul.f32 %v2123_v14, %v2158_v40 }
 0x186   :  { %3701 = vst [vmem:[#allocation87_spill] sm:$0xff] %v2500_v50  ;;  %v2508_v0 = vadd.f32 %v1159_v63, %v1111_v44  ;;  %v2510_v34 = vadd.f32 %v1160_v1, %v1112_v46  ;;  %v2534_v44 = vmul.f32 %v2123_v14, %v2131_v56  ;;  %v2538_v32 = vmul.f32 %v1953_v38, %v2118_v9  ;;  %v3711_v63 = vld [vmem:[#allocation59_spill] sm:$0xff] }
 0x187   :  { %v2542_v46 = vmul.f32 %v1953_v38, %v2169_v36  ;;  %v2546_v29 = vmul.f32 %v2123_v14, %v2118_v9  ;;  %v2550_v35 = vmul.f32 %v2123_v14, %v2169_v36  ;;  %v2554_v57 = vmul.f32 %v2171_v23, %v2118_v9  ;;  %v3712_v1 = vld [vmem:[#allocation55_spill] sm:$0xff] }
 0x188   :  { %v2492_v30 = vpop.permute.xlu0 %453  ;;  %v2498_v61 = vpop.permute.xlu1 %528  ;;  %3703 = vst [vmem:[#allocation89_spill] sm:$0xff] %v2508_v0  ;;  %3704 = vst [vmem:[#allocation90_spill] sm:$0xff] %v2510_v34  ;;  %v2562_v38 = vmul.f32 %v2171_v23, %v2131_v56  ;;  %v2566_v22 = vmul.f32 %v2171_v23, %v2169_v36  ;;  %v2570_v14 = vmul.f32 %v2181_v55, %v2109_v59  ;;  %v3710_v36 = vld [vmem:[#allocation54_spill] sm:$0xff] }
 0x189   :  { %v2574_v9 = vmul.f32 %v2181_v55, %v3707_v19  ;;  %v907_v40 = vmul.f32 %v2181_v55, %v3708_v3  ;;  %v2580_v58 = vmul.f32 %v2181_v55, %v3709_v26  ;;  %v893_v23 = vmul.f32 %v3710_v36, %v2038_v48  ;;  %v3713_v19 = vld [vmem:[#allocation56_spill] sm:$0xff]  ;;  %v3714_v26 = vld [vmem:[#allocation61_spill] sm:$0xff] }
 0x18a   :  { %3705 = vst [vmem:[#allocation91_spill] sm:$0xff] %v2566_v22  ;;  %3706 = vst [vmem:[#allocation92_spill] sm:$0xff] %v2570_v14  ;;  %v894_v45 = vmul.f32 %v3710_v36, %v2080_v8  ;;  %v895_v54 = vmul.f32 %v3710_v36, %v2053_v52  ;;  %v482_v34 = vsel %vm469_vm3, %v3712_v1, %v3711_v63  ;;  %v3715_v52 = vld [vmem:[#allocation58_spill] sm:$0xff]  ;;  %v3716_v8 = vld [vmem:[#allocation63_spill] sm:$0xff] }
 0x18b   :  { %v476_v55 = vsel %vm469_vm3, %v3711_v63, %v3713_v19  ;;  %v470_v49 = vsel %vm469_vm3, %v3713_v19, %v3714_v26  ;;  %v488_v59 = vsel %vm469_vm3, %v3714_v26, %v3712_v1  ;;  %v896_v13 = vmul.f32 %v3710_v36, %v2091_v15  ;;  %v3717_v48 = vld [vmem:[#allocation57_spill] sm:$0xff]  ;;  %v3720_v1 = vld [vmem:[#allocation66_spill] sm:$0xff] }
 0x18c   :  { %v2516_v24 = vpop.permute.xlu0 %526  ;;  %v2518_v20 = vpop.permute.xlu1 %552  ;;  %v573_v63 = vsel %vm566_vm7, %v3716_v8, %v3715_v52  ;;  %v579_v19 = vsel %vm566_vm7, %v3717_v48, %v3716_v8  ;;  %v2623_v26 = vmul.f32 %v2275_v21, %v482_v34  ;;  %v567_v36 = vsel %vm566_vm7, %v3715_v52, %v3720_v1  ;;  %v3724_v52 = vld [vmem:[#allocation52_spill] sm:$0xff] }
 0x18d   :  { %v585_v15 = vsel %vm566_vm7, %v3720_v1, %v3717_v48  ;;  %v2640_v34 = vmul.f32 %v2263_v43, %v488_v59  ;;  %v2643_v47 = vmul.f32 %v2332_v42, %v470_v49  ;;  %v2648_v48 = vmul.f32 %v2289_v2, %v579_v19 }
 0x18e   :  { %3719 = vst [vmem:[#allocation59_spill] sm:$0xff] %v2623_v26  ;;  %v2651_v1 = vmul.f32 %v2292_v5, %v573_v63  ;;  %v2660_v49 = vmul.f32 %v2322_v17, %v567_v36  ;;  %v582_v63 = vsel %vm566_vm7, %v2353_v25, %v2383_v10 }
 0x18f   :  { %3722 = vst [vmem:[#allocation56_spill] sm:$0xff] %v2640_v34  ;;  %3723 = vst [vmem:[#allocation61_spill] sm:$0xff] %v2643_v47 }
 0x190   :  { %v2582_v56 = vpop.permute.xlu0 %550  ;;  %v444_v0 = vpop.permute.xlu1 %443  ;;  %3725 = vst [vmem:[#allocation58_spill] sm:$0xff] %v2648_v48  ;;  %3726 = vst [vmem:[#allocation63_spill] sm:$0xff] %v2651_v1  ;;  %v3732_v48 = vld [vmem:[#allocation78_spill] sm:$0xff] }
 0x191   :  { %v481_v50 = vsel %vm469_vm3, %v444_v0, %v2468_v16  ;;  %v487_v8 = vsel %vm469_vm3, %v2425_v7, %v444_v0  ;;  %3727 = vst [vmem:[#allocation57_spill] sm:$0xff] %v2660_v49  ;;  %v3731_v49 = vld [vmem:[#allocation53_spill] sm:$0xff] }
 0x192   :  { %v2620_v3 = vmul.f32 %v2306_v11, %v481_v50  ;;  %v2637_v50 = vmul.f32 %v2306_v11, %v476_v55  ;;  %v2663_v55 = vmul.f32 %v2344_v41, %v585_v15  ;;  %v2670_v19 = vmul.f32 %v2275_v21, %v487_v8 }
 0x193   :  { %v846_v1 = vmul.f32 %v3731_v49, %v2409_v39  ;;  %v847_v8 = vmul.f32 %v3731_v49, %v2415_v62  ;;  %v848_v47 = vmul.f32 %v3731_v49, %v3732_v48  ;;  %v3735_v62 = vld [vmem:[#allocation5_spill] sm:$0xff] }
 0x194   :  { %3718 = vst [vmem:[#allocation54_spill] sm:$0xff] %v2620_v3  ;;  %v442_v60 = vpop.permute.xlu0 %441  ;;  %3721 = vst [vmem:[#allocation55_spill] sm:$0xff] %v2637_v50  ;;  %v859_v22 = vmul.f32 %v3724_v52, %v2620_v3  ;;  %v468_v14 = vpop.permute.xlu1 %467  ;;  %v576_v3 = vsel %vm566_vm7, %v2383_v10, %v2364_v37  ;;  %v3733_v10 = vld [vmem:[#allocation74_spill] sm:$0xff]  ;;  %v858_v39 = vmul.f32 %v3724_v52, %v2670_v19 }
 0x195   :  { %v480_v0 = vsel %vm469_vm3, %v442_v60, %v2492_v30  ;;  %v486_v59 = vsel %vm469_vm3, %v2457_v12, %v442_v60  ;;  %3728 = vst [vmem:[#allocation66_spill] sm:$0xff] %v2663_v55  ;;  %3729 = vst [vmem:[#allocation52_spill] sm:$0xff] %v2670_v19  ;;  %v475_v60 = vsel %vm469_vm3, %v2468_v16, %v468_v14 }
 0x196   :  { %v2680_v15 = vmul.f32 %v2306_v11, %v480_v0  ;;  %v2682_v55 = vadd.f32 %v907_v40, %v859_v22  ;;  %v570_v16 = vsel %vm566_vm7, %v2364_v37, %v3733_v10  ;;  %v2695_v11 = vmul.f32 %v2289_v2, %v582_v63  ;;  %v3734_v22 = vld [vmem:[#allocation76_spill] sm:$0xff] }
 0x197   :  { %v845_v40 = vmul.f32 %v3731_v49, %v3734_v22  ;;  %v588_v0 = vsel %vm566_vm7, %v3733_v10, %v2353_v25  ;;  %v2708_v37 = vmul.f32 %v2332_v42, %v475_v60  ;;  %v511_v63 = vmul.f32 %v2275_v21, %v486_v59 }
 0x198   :  { %v466_v36 = vpop.permute.xlu0 %465  ;;  %3730 = vst [vmem:[#allocation93_spill] sm:$0xff] %v2682_v55  ;;  %v541_v50 = vpop.permute.xlu1 %540  ;;  %v663_v48 = vmul.f32 %v3735_v62, %v2680_v15  ;;  %v3736_v55 = vld [vmem:[#allocation6_spill] sm:$0xff]  ;;  %v2714_v49 = vmul.f32 %v2292_v5, %v576_v3  ;;  %v2717_v22 = vmul.f32 %v2322_v17, %v570_v16  ;;  %v493_v25 = vsel %vm469_vm3, %v468_v14, %v2425_v7 }
 0x199   :  { %v1047_v26 = vmul.f32 %v3736_v55, %v2680_v15  ;;  %v2724_v60 = vmul.f32 %v2344_v41, %v588_v0  ;;  %v2727_v59 = vadd.f32 %v894_v45, %v846_v1  ;;  %v2729_v34 = vadd.f32 %v896_v13, %v848_v47 }
 0x19a   :  { %v735_v10 = vadd.f32 %v2526_v31, %v663_v48  ;;  %v474_v3 = vsel %vm469_vm3, %v2492_v30, %v466_v36  ;;  %v492_v7 = vsel %vm469_vm3, %v466_v36, %v2457_v12  ;;  %v2737_v14 = vadd.f32 %v893_v23, %v845_v40  ;;  %v3737_v40 = vld [vmem:[#allocation47_spill] sm:$0xff] }
 0x19b   :  { %v1119_v21 = vadd.f32 %v2534_v44, %v1047_v26  ;;  %v2739_v31 = vadd.f32 %v895_v54, %v847_v8  ;;  %v2742_v48 = vmul.f32 %v2263_v43, %v493_v25  ;;  %v2746_v44 = vmul.f32 %v3724_v52, %v2708_v37 }
 0x19c   :  { %v539_v19 = vpop.permute.xlu0 %538  ;;  %v662_v13 = vmul.f32 %v3735_v62, %v511_v63  ;;  %v565_v47 = vpop.permute.xlu1 %564  ;;  %v2750_v30 = vadd.f32 %v2574_v9, %v858_v39  ;;  %v1046_v45 = vmul.f32 %v3736_v55, %v511_v63  ;;  %v578_v12 = vsel %vm566_vm7, %v541_v50, %v2518_v20 }
 0x19d   :  { %v510_v23 = vmul.f32 %v2263_v43, %v492_v7  ;;  %v513_v54 = vmul.f32 %v2332_v42, %v474_v3  ;;  %v584_v1 = vsel %vm566_vm7, %v2498_v61, %v541_v50  ;;  %v577_v39 = vsel %vm566_vm7, %v539_v19, %v2582_v56 }
 0x19e   :  { %v583_v9 = vsel %vm566_vm7, %v2516_v24, %v539_v19  ;;  %v572_v50 = vsel %vm566_vm7, %v2518_v20, %v565_v47  ;;  %v590_v8 = vsel %vm566_vm7, %v565_v47, %v2498_v61  ;;  %v734_v16 = vadd.f32 %v2522_v28, %v662_v13  ;;  %v3740_v47 = vld [vmem:[#allocation9_spill] sm:$0xff] }
 0x19f   :  { %v661_v43 = vmul.f32 %v3735_v62, %v510_v23  ;;  %v664_v42 = vmul.f32 %v3735_v62, %v513_v54  ;;  %v854_v19 = vmul.f32 %v3737_v40, %v511_v63  ;;  %v1045_v0 = vmul.f32 %v3736_v55, %v510_v23 }
 0x1a0   :  { %v563_v26 = vpop.permute.xlu0 %562  ;;  %v1118_v25 = vadd.f32 %v2530_v33, %v1046_v45  ;;  %v2784_v62 = vmul.f32 %v2289_v2, %v584_v1  ;;  %v2787_v3 = vmul.f32 %v2292_v5, %v578_v12  ;;  %v2792_v28 = vmul.f32 %v2322_v17, %v572_v50  ;;  %v3741_v12 = vld [vmem:[#allocation10_spill] sm:$0xff] }
 0x1a1   :  { %v571_v36 = vsel %vm566_vm7, %v2582_v56, %v563_v26  ;;  %v1048_v56 = vmul.f32 %v3736_v55, %v513_v54  ;;  %v733_v20 = vadd.f32 %v2538_v32, %v661_v43  ;;  %v1117_v61 = vadd.f32 %v2546_v29, %v1045_v0 }
 0x1a2   :  { %3738 = vst [vmem:[#allocation53_spill] sm:$0xff] %v2792_v28  ;;  %v2795_v63 = vmul.f32 %v2344_v41, %v590_v8  ;;  %v607_v55 = vmul.f32 %v2289_v2, %v583_v9  ;;  %v736_v33 = vadd.f32 %v2542_v46, %v664_v42  ;;  %v608_v7 = vmul.f32 %v2292_v5, %v577_v39 }
 0x1a3   :  { %v589_v13 = vsel %vm566_vm7, %v563_v26, %v2516_v24  ;;  %v609_v32 = vmul.f32 %v2322_v17, %v571_v36  ;;  %v1120_v29 = vadd.f32 %v2550_v35, %v1048_v56 }
 0x1a4   :  { %3739 = vst [vmem:[#allocation74_spill] sm:$0xff] %v2795_v63  ;;  %v781_v45 = vmul.f32 %v3740_v47, %v607_v55  ;;  %v1165_v1 = vmul.f32 %v3741_v12, %v607_v55  ;;  %v610_v43 = vmul.f32 %v2344_v41, %v589_v13  ;;  %v782_v2 = vmul.f32 %v3740_v47, %v608_v7 }
 0x1a5   :  { %v1166_v46 = vmul.f32 %v3741_v12, %v608_v7  ;;  %v783_v5 = vmul.f32 %v3740_v47, %v609_v32  ;;  %v1167_v39 = vmul.f32 %v3741_v12, %v609_v32 }
 0x1a6   :  { %v784_v24 = vmul.f32 %v3740_v47, %v610_v43  ;;  %v1168_v17 = vmul.f32 %v3741_v12, %v610_v43  ;;  %v2814_v26 = vadd.f32 %v1165_v1, %v1117_v61  ;;  %v2816_v35 = vadd.f32 %v781_v45, %v733_v20  ;;  %v3751_v1 = vld [vmem:[#allocation65_spill] sm:$0xff] }
 0x1a7   :  { %v2818_v36 = vadd.f32 %v1166_v46, %v1118_v25  ;;  %v2820_v41 = vadd.f32 %v1167_v39, %v1119_v21  ;;  %v2822_v42 = vadd.f32 %v782_v2, %v734_v16  ;;  %v2824_v50 = vadd.f32 %v783_v5, %v735_v10  ;;  %v3752_v46 = vld [vmem:[#allocation67_spill] sm:$0xff]  ;;  %v3753_v39 = vld [vmem:[#allocation70_spill] sm:$0xff] }
 0x1a8   :  { %3742 = vst [vmem:[#allocation5_spill] sm:$0xff] %v2816_v35  ;;  %v855_v20 = vmul.f32 %v3737_v40, %v2680_v15  ;;  %v853_v25 = vmul.f32 %v3737_v40, %v510_v23  ;;  %v2833_v13 = vadd.f32 %v1168_v17, %v1120_v29  ;;  %v2835_v21 = vadd.f32 %v784_v24, %v736_v33  ;;  %v3750_v23 = vld [vmem:[#allocation51_spill] sm:$0xff] }
 0x1a9   :  { %v947_v9 = vpop.permute.xlu1 %946  ;;  %3743 = vst [vmem:[#allocation6_spill] sm:$0xff] %v2822_v42  ;;  %3744 = vst [vmem:[#allocation47_spill] sm:$0xff] %v2824_v50  ;;  %v857_v15 = vmul.f32 %v3724_v52, %v2742_v48  ;;  %v977_v33 = vmul.f32 %v3750_v23, %v2784_v62  ;;  %v856_v29 = vmul.f32 %v3737_v40, %v513_v54  ;;  %v3754_v54 = vld [vmem:[#allocation72_spill] sm:$0xff]  ;;  %v3776_v50 = vld [vmem:[#allocation85_spill] sm:$0xff] }
 0x1aa   :  { %v969_v8 = vmul.f32 %v947_v9, %v2695_v11  ;;  %v970_v0 = vmul.f32 %v947_v9, %v2714_v49  ;;  %v971_v56 = vmul.f32 %v947_v9, %v2717_v22  ;;  %v972_v61 = vmul.f32 %v947_v9, %v2724_v60  ;;  %3745 = vst [vmem:[#allocation9_spill] sm:$0xff] %v2835_v21  ;;  %v3767_v21 = vld [vmem:[#allocation20_spill] sm:$0xff]  ;;  %v3777_v42 = vld [vmem:[#allocation86_spill] sm:$0xff] }
 0x1ab   :  { %v980_v52 = vmul.f32 %v3750_v23, %v2795_v63  ;;  %v926_v17 = vadd.f32 %v2558_v4, %v854_v19 }
 0x1ac   :  { %v2838_v10 = vadd.f32 %v970_v0, %v2504_v18  ;;  %v2841_v47 = vadd.f32 %v972_v61, %v2506_v6  ;;  %v2844_v45 = vadd.f32 %v969_v8, %v2512_v53  ;;  %v2847_v12 = vadd.f32 %v971_v56, %v2514_v51  ;;  %v3758_v61 = vld [vmem:[#allocation59_spill] sm:$0xff] }
 0x1ad   :  { %v819_v16 = vpop.permute.xlu0 %818  ;;  %v979_v18 = vmul.f32 %v3750_v23, %v2792_v28  ;;  %v978_v53 = vmul.f32 %v3750_v23, %v2787_v3  ;;  %v932_v51 = vadd.f32 %v2580_v58, %v2746_v44  ;;  %v927_v0 = vadd.f32 %v2562_v38, %v855_v20  ;;  %v3757_v44 = vld [vmem:[#allocation56_spill] sm:$0xff] }
 0x1ae   :  { %3746 = vst [vmem:[#allocation10_spill] sm:$0xff] %v2838_v10  ;;  %3747 = vst [vmem:[#allocation94_spill] sm:$0xff] %v2841_v47  ;;  %v841_v6 = vmul.f32 %v819_v16, %v3751_v1  ;;  %v815_v2 = vpop.permute.xlu1 %814  ;;  %v842_v5 = vmul.f32 %v819_v16, %v3752_v46  ;;  %v843_v24 = vmul.f32 %v819_v16, %v3753_v39  ;;  %v3759_v46 = vld [vmem:[#allocation92_spill] sm:$0xff]  ;;  %v3760_v10 = vld [vmem:[#allocation93_spill] sm:$0xff] }
 0x1af   :  { %3748 = vst [vmem:[#allocation95_spill] sm:$0xff] %v2844_v45  ;;  %3749 = vst [vmem:[#allocation96_spill] sm:$0xff] %v2847_v12  ;;  %v844_v40 = vmul.f32 %v819_v16, %v3754_v54  ;;  %v2868_v9 = vadd.f32 %v978_v53, %v2750_v30  ;;  %v2870_v8 = vadd.f32 %v980_v52, %v932_v51  ;;  %v3762_v51 = vld [vmem:[#allocation55_spill] sm:$0xff]  ;;  %v3766_v45 = vld [vmem:[#allocation14_spill] sm:$0xff] }
 0x1b0   :  { %v925_v58 = vadd.f32 %v2554_v57, %v853_v25  ;;  %v837_v56 = vmul.f32 %v815_v2, %v3757_v44  ;;  %v838_v23 = vmul.f32 %v815_v2, %v3758_v61  ;;  %v929_v47 = vadd.f32 %v3759_v46, %v857_v15  ;;  %v3764_v57 = vld [vmem:[#allocation91_spill] sm:$0xff] }
 0x1b1   :  { %3755 = vst [vmem:[#allocation51_spill] sm:$0xff] %v2868_v9  ;;  %3756 = vst [vmem:[#allocation65_spill] sm:$0xff] %v2870_v8  ;;  %v2878_v16 = vadd.f32 %v979_v18, %v3760_v10  ;;  %v839_v52 = vmul.f32 %v815_v2, %v3762_v51  ;;  %v3763_v8 = vld [vmem:[#allocation61_spill] sm:$0xff]  ;;  %v928_v25 = vadd.f32 %v3764_v57, %v856_v29  ;;  %v3768_v46 = vld [vmem:[#allocation15_spill] sm:$0xff] }
 0x1b2   :  { %v951_v1 = vpop.permute.xlu0 %950  ;;  %v840_v38 = vmul.f32 %v815_v2, %v3763_v8  ;;  %v2883_v9 = vadd.f32 %v977_v33, %v929_v47  ;;  %v3769_v18 = vld [vmem:[#allocation21_spill] sm:$0xff]  ;;  %v3774_v33 = vld [vmem:[#allocation83_spill] sm:$0xff] }
 0x1b3   :  { %3761 = vst [vmem:[#allocation67_spill] sm:$0xff] %v2878_v16  ;;  %v973_v4 = vmul.f32 %v951_v1, %v607_v55  ;;  %v974_v19 = vmul.f32 %v951_v1, %v608_v7  ;;  %v975_v30 = vmul.f32 %v951_v1, %v609_v32  ;;  %v976_v53 = vmul.f32 %v951_v1, %v610_v43  ;;  %v863_v20 = vpop.permute.xlu1 %862  ;;  %v3775_v16 = vld [vmem:[#allocation84_spill] sm:$0xff] }
 0x1b4   :  { %3765 = vst [vmem:[#allocation56_spill] sm:$0xff] %v2883_v9  ;;  %v885_v12 = vmul.f32 %v863_v20, %v3766_v45  ;;  %v886_v15 = vmul.f32 %v863_v20, %v3767_v21  ;;  %v887_v10 = vmul.f32 %v863_v20, %v3768_v46  ;;  %v888_v55 = vmul.f32 %v863_v20, %v3769_v18 }
 0x1b5   :  { %v2889_v32 = vadd.f32 %v974_v19, %v926_v17  ;;  %v2891_v43 = vadd.f32 %v975_v30, %v927_v0  ;;  %v2893_v1 = vadd.f32 %v973_v4, %v925_v58  ;;  %v2895_v2 = vadd.f32 %v976_v53, %v928_v25  ;;  %v3778_v19 = vld [vmem:[#allocation16_spill] sm:$0xff]  ;;  %v3779_v30 = vld [vmem:[#allocation23_spill] sm:$0xff]  ;;  %v3780_v4 = vld [vmem:[#allocation18_spill] sm:$0xff] }
 0x1b6   :  { %v943_v7 = vpop.permute.xlu0 %942  ;;  %v909_v29 = vadd.f32 %v885_v12, %v837_v56  ;;  %v911_v47 = vadd.f32 %v887_v10, %v839_v52  ;;  %v910_v39 = vadd.f32 %v886_v15, %v838_v23  ;;  %v912_v17 = vadd.f32 %v888_v55, %v840_v38  ;;  %v3781_v25 = vld [vmem:[#allocation24_spill] sm:$0xff]  ;;  %v3786_v55 = vld [vmem:[#allocation58_spill] sm:$0xff] }
 0x1b7   :  { %3770 = vst [vmem:[#allocation59_spill] sm:$0xff] %v2889_v32  ;;  %3771 = vst [vmem:[#allocation92_spill] sm:$0xff] %v2891_v43  ;;  %v965_v57 = vmul.f32 %v943_v7, %v3774_v33  ;;  %v966_v9 = vmul.f32 %v943_v7, %v3775_v16  ;;  %v967_v54 = vmul.f32 %v943_v7, %v3776_v50  ;;  %v867_v20 = vpop.permute.xlu1 %866  ;;  %v3789_v32 = vld [vmem:[#allocation66_spill] sm:$0xff] }
 0x1b8   :  { %3772 = vst [vmem:[#allocation93_spill] sm:$0xff] %v2893_v1  ;;  %3773 = vst [vmem:[#allocation55_spill] sm:$0xff] %v2895_v2  ;;  %v968_v63 = vmul.f32 %v943_v7, %v3777_v42  ;;  %v889_v0 = vmul.f32 %v867_v20, %v3778_v19  ;;  %v890_v58 = vmul.f32 %v867_v20, %v3779_v30  ;;  %v3787_v30 = vld [vmem:[#allocation63_spill] sm:$0xff] }
 0x1b9   :  { %v891_v53 = vmul.f32 %v867_v20, %v3780_v4  ;;  %v892_v12 = vmul.f32 %v867_v20, %v3781_v25  ;;  %v2906_v52 = vadd.f32 %v966_v9, %v2727_v59  ;;  %v2912_v7 = vadd.f32 %v965_v57, %v2737_v14  ;;  %v3788_v20 = vld [vmem:[#allocation57_spill] sm:$0xff]  ;;  %v3792_v57 = vld [vmem:[#allocation68_spill] sm:$0xff] }
 0x1ba   :  { %v935_v56 = vpop.permute.xlu0 %934  ;;  %v2909_v10 = vadd.f32 %v968_v63, %v2729_v34  ;;  %v2915_v23 = vadd.f32 %v967_v54, %v2739_v31  ;;  %v913_v38 = vadd.f32 %v889_v0, %v841_v6  ;;  %v914_v9 = vadd.f32 %v890_v58, %v842_v5  ;;  %v3793_v54 = vld [vmem:[#allocation69_spill] sm:$0xff]  ;;  %v3798_v5 = vld [vmem:[#allocation42_spill] sm:$0xff] }
 0x1bb   :  { %3782 = vst [vmem:[#allocation61_spill] sm:$0xff] %v2906_v52  ;;  %3784 = vst [vmem:[#allocation14_spill] sm:$0xff] %v2912_v7  ;;  %v915_v15 = vadd.f32 %v891_v53, %v843_v24  ;;  %v957_v19 = vmul.f32 %v935_v56, %v3786_v55  ;;  %v958_v2 = vmul.f32 %v935_v56, %v3787_v30  ;;  %v3794_v24 = vld [vmem:[#allocation71_spill] sm:$0xff]  ;;  %v3795_v53 = vld [vmem:[#allocation73_spill] sm:$0xff] }
 0x1bc   :  { %3783 = vst [vmem:[#allocation91_spill] sm:$0xff] %v2909_v10  ;;  %3785 = vst [vmem:[#allocation20_spill] sm:$0xff] %v2915_v23  ;;  %v959_v43 = vmul.f32 %v935_v56, %v3788_v20  ;;  %v960_v59 = vmul.f32 %v935_v56, %v3789_v32  ;;  %v916_v1 = vadd.f32 %v892_v12, %v844_v40  ;;  %v939_v34 = vpop.permute.xlu1 %938  ;;  %v3799_v40 = vld [vmem:[#allocation33_spill] sm:$0xff] }
 0x1bd   :  { %v2921_v63 = vadd.f32 %v958_v2, %v910_v39  ;;  %v2923_v14 = vadd.f32 %v957_v19, %v909_v29  ;;  %v961_v31 = vmul.f32 %v939_v34, %v3792_v57  ;;  %v962_v6 = vmul.f32 %v939_v34, %v3793_v54  ;;  %v3800_v2 = vld [vmem:[#allocation54_spill] sm:$0xff]  ;;  %v3805_v52 = vld [vmem:[#allocation29_spill] sm:$0xff] }
 0x1be   :  { %v963_v0 = vmul.f32 %v939_v34, %v3794_v24  ;;  %v964_v10 = vmul.f32 %v939_v34, %v3795_v53  ;;  %v2931_v7 = vadd.f32 %v960_v59, %v912_v17  ;;  %v2933_v56 = vadd.f32 %v959_v43, %v911_v47  ;;  %v3802_v17 = vld [vmem:[#allocation27_spill] sm:$0xff]  ;;  %v3803_v59 = vld [vmem:[#allocation13_spill] sm:$0xff]  ;;  %v3804_v47 = vld [vmem:[#allocation34_spill] sm:$0xff] }
 0x1bf   :  { %3790 = vst [vmem:[#allocation15_spill] sm:$0xff] %v2921_v63  ;;  %3791 = vst [vmem:[#allocation21_spill] sm:$0xff] %v2923_v14  ;;  %v2929_v23 = vpop.permute.xlu0 %642  ;;  %v715_v39 = vmul.f32 %v3799_v40, %v3798_v5  ;;  %v2939_v58 = vadd.f32 %v962_v6, %v914_v9  ;;  %v2943_v19 = vadd.f32 %v961_v31, %v913_v38  ;;  %v3808_v31 = vld [vmem:[#allocation75_spill] sm:$0xff]  ;;  %v3809_v6 = vld [vmem:[#allocation77_spill] sm:$0xff] }
 0x1c0   :  { %3796 = vst [vmem:[#allocation83_spill] sm:$0xff] %v2931_v7  ;;  %3797 = vst [vmem:[#allocation84_spill] sm:$0xff] %v2933_v56  ;;  %v667_v29 = vmul.f32 %v2929_v23, %v3800_v2  ;;  %v2941_v12 = vadd.f32 %v964_v10, %v916_v1  ;;  %v2945_v57 = vadd.f32 %v963_v0, %v915_v15  ;;  %v3806_v7 = vld [vmem:[#allocation37_spill] sm:$0xff]  ;;  %v3807_v10 = vld [vmem:[#allocation76_spill] sm:$0xff] }
 0x1c1   :  { %v701_v43 = vmul.f32 %v3803_v59, %v3802_v17  ;;  %v702_v54 = vmul.f32 %v3803_v59, %v3804_v47  ;;  %v703_v14 = vmul.f32 %v3803_v59, %v3805_v52  ;;  %v704_v9 = vmul.f32 %v3803_v59, %v3806_v7  ;;  %v3811_v56 = vld [vmem:[#allocation25_spill] sm:$0xff]  ;;  %v3812_v17 = vld [vmem:[#allocation38_spill] sm:$0xff]  ;;  %v3814_v47 = vld [vmem:[#allocation12_spill] sm:$0xff] }
 0x1c2   :  { %v2947_v34 = vadd.f32 %v715_v39, %v667_v29  ;;  %v3810_v39 = vld [vmem:[#allocation78_spill] sm:$0xff]  ;;  %v705_v63 = vmul.f32 %v3812_v17, %v3811_v56 }
 0x1c3   :  { %v628_v1 = vpop.permute.xlu0 %627  ;;  %v3813_v5 = vld [vmem:[#allocation82_spill] sm:$0xff] }
 0x1c4   :  { %3801 = vst [vmem:[#allocation85_spill] sm:$0xff] %v2947_v34  ;;  %v653_v38 = vmul.f32 %v628_v1, %v3807_v10  ;;  %v654_v15 = vmul.f32 %v628_v1, %v3808_v31  ;;  %v655_v0 = vmul.f32 %v628_v1, %v3809_v6  ;;  %v656_v29 = vmul.f32 %v628_v1, %v3810_v39  ;;  %v3815_v7 = vld [vmem:[#allocation22_spill] sm:$0xff] }
 0x1c5   :  { %v657_v2 = vmul.f32 %v3814_v47, %v3813_v5  ;;  %v773_v59 = vmul.f32 %v3815_v7, %v3774_v33  ;;  %v774_v10 = vmul.f32 %v3815_v7, %v3775_v16  ;;  %v775_v31 = vmul.f32 %v3815_v7, %v3776_v50  ;;  %v3816_v39 = vld [vmem:[#allocation50_spill] sm:$0xff] }
 0x1c6   :  { %v725_v53 = vadd.f32 %v701_v43, %v653_v38  ;;  %v726_v52 = vadd.f32 %v702_v54, %v654_v15  ;;  %v727_v25 = vadd.f32 %v703_v14, %v655_v0  ;;  %v728_v24 = vadd.f32 %v704_v9, %v656_v29  ;;  %v3817_v54 = vld [vmem:[#allocation30_spill] sm:$0xff]  ;;  %v3818_v0 = vld [vmem:[#allocation41_spill] sm:$0xff] }
 0x1c7   :  { %v776_v1 = vmul.f32 %v3815_v7, %v3777_v42  ;;  %v618_v6 = vpop.permute.xlu0 %617  ;;  %v777_v4 = vmul.f32 %v3816_v39, %v2695_v11  ;;  %v693_v33 = vmul.f32 %v3817_v54, %v3766_v45  ;;  %v694_v42 = vmul.f32 %v3817_v54, %v3767_v21  ;;  %v3819_v7 = vld [vmem:[#allocation79_spill] sm:$0xff] }
 0x1c8   :  { %v645_v43 = vmul.f32 %v618_v6, %v3757_v44  ;;  %v646_v14 = vmul.f32 %v618_v6, %v3758_v61  ;;  %v797_v9 = vadd.f32 %v773_v59, %v725_v53  ;;  %v2979_v38 = vadd.f32 %v774_v10, %v726_v52  ;;  %v3821_v59 = vld [vmem:[#allocation31_spill] sm:$0xff] }
 0x1c9   :  { %v2981_v16 = vadd.f32 %v775_v31, %v727_v25  ;;  %v2983_v50 = vadd.f32 %v776_v1, %v728_v24  ;;  %v765_v29 = vmul.f32 %v3818_v0, %v3786_v55  ;;  %v658_v35 = vmul.f32 %v3814_v47, %v3819_v7  ;;  %v2993_v25 = vpop.permute.xlu1 %1467 }
 0x1ca   :  { %v717_v15 = vadd.f32 %v693_v33, %v645_v43  ;;  %v729_v34 = vadd.f32 %v705_v63, %v657_v2  ;;  %1201 = vrot.lane.b32.xlu1 %v797_v9, %s1766_s23  ;;  %v647_v53 = vmul.f32 %v618_v6, %v3762_v51  ;;  %v718_v52 = vadd.f32 %v694_v42, %v646_v14  ;;  %v3822_v2 = vld [vmem:[#allocation81_spill] sm:$0xff] }
 0x1cb   :  { %3820 = vst [vmem:[#allocation86_spill] sm:$0xff] %v2993_v25  ;;  %v706_v10 = vmul.f32 %v3812_v17, %v3821_v59  ;;  %v778_v31 = vmul.f32 %v3816_v39, %v2714_v49  ;;  %v695_v43 = vmul.f32 %v3817_v54, %v3768_v46  ;;  %v766_v63 = vmul.f32 %v3818_v0, %v3787_v30 }
 0x1cc   :  { %v789_v24 = vadd.f32 %v765_v29, %v717_v15  ;;  %v801_v1 = vadd.f32 %v777_v4, %v729_v34  ;;  %v659_v14 = vmul.f32 %v3814_v47, %v3822_v2  ;;  %v648_v9 = vmul.f32 %v618_v6, %v3763_v8  ;;  %v3823_v29 = vld [vmem:[#allocation28_spill] sm:$0xff] }
 0x1cd   :  { %v730_v33 = vadd.f32 %v706_v10, %v658_v35  ;;  %v719_v42 = vadd.f32 %v695_v43, %v647_v53  ;;  %v790_v15 = vadd.f32 %v766_v63, %v718_v52  ;;  %v707_v4 = vmul.f32 %v3812_v17, %v3823_v29  ;;  %v3016_v35 = vpop.permute.xlu1 %1462  ;;  %v3825_v53 = vld [vmem:[#allocation80_spill] sm:$0xff]  ;;  %v3826_v43 = vld [vmem:[#allocation35_spill] sm:$0xff] }
 0x1ce   :  { %1197 = vrot.lane.b32.xlu0 %v789_v24, %s1766_s23  ;;  %1203 = vrot.lane.b32.xlu1 %v801_v1, %s1766_s23  ;;  %v779_v34 = vmul.f32 %v3816_v39, %v2717_v22  ;;  %v696_v24 = vmul.f32 %v3817_v54, %v3769_v18  ;;  %v767_v28 = vmul.f32 %v3818_v0, %v3788_v20 }
 0x1cf   :  { %v802_v25 = vadd.f32 %v778_v31, %v730_v33  ;;  %3824 = vst [vmem:[#allocation16_spill] sm:$0xff] %v3016_v35  ;;  %v731_v6 = vadd.f32 %v707_v4, %v659_v14  ;;  %v660_v52 = vmul.f32 %v3814_v47, %v3825_v53  ;;  %v708_v31 = vmul.f32 %v3812_v17, %v3826_v43  ;;  %v3827_v33 = vld [vmem:[#allocation32_spill] sm:$0xff] }
 0x1d0   :  { %v720_v10 = vadd.f32 %v696_v24, %v648_v9  ;;  %v791_v1 = vadd.f32 %v767_v28, %v719_v42  ;;  %v780_v54 = vmul.f32 %v3816_v39, %v2724_v60  ;;  %v1029_v35 = vmul.f32 %v3827_v33, %v3757_v44  ;;  %v3829_v28 = vld [vmem:[#allocation46_spill] sm:$0xff]  ;;  %v3830_v39 = vld [vmem:[#allocation43_spill] sm:$0xff] }
 0x1d1   :  { %v803_v63 = vadd.f32 %v779_v34, %v731_v6  ;;  %v768_v14 = vmul.f32 %v3818_v0, %v3789_v32  ;;  %v732_v47 = vadd.f32 %v708_v31, %v660_v52  ;;  %v1077_v17 = vmul.f32 %v3829_v28, %v3766_v45  ;;  %v3831_v44 = vld [vmem:[#allocation62_spill] sm:$0xff]  ;;  %v3832_v0 = vld [vmem:[#allocation19_spill] sm:$0xff] }
 0x1d2   :  { %1209 = vrot.lane.b32.xlu0 %v790_v15, %s1766_s23  ;;  %1215 = vrot.lane.b32.xlu1 %v802_v25, %s1766_s23  ;;  %v3828_v25 = vld [vmem:[#allocation17_spill] sm:$0xff]  ;;  %v1149_v42 = vmul.f32 %v3830_v39, %v3786_v55  ;;  %v337_v34 = vand.u32 255, %v3831_v44  ;;  %v1089_v24 = vmul.f32 %v3832_v0, %v3811_v56  ;;  %v3833_v6 = vld [vmem:[#allocation26_spill] sm:$0xff]  ;;  %v1078_v55 = vmul.f32 %v3829_v28, %v3767_v21 }
 0x1d3   :  { %v1041_v9 = vmul.f32 %v3828_v25, %v3813_v5  ;;  %v792_v4 = vadd.f32 %v768_v14, %v720_v10  ;;  %v1161_v52 = vmul.f32 %v3833_v6, %v2695_v11  ;;  %v1030_v5 = vmul.f32 %v3827_v33, %v3758_v61 }
 0x1d4   :  { %v1101_v45 = vadd.f32 %v1077_v17, %v1029_v35  ;;  %v1042_v10 = vmul.f32 %v3828_v25, %v3819_v7  ;;  %v1150_v11 = vmul.f32 %v3830_v39, %v3787_v30  ;;  %vm393_vm13 = vcmp.ge.s32.totalorder %v337_v34, 16 }
 0x1d5   :  { %v1113_v31 = vadd.f32 %v1089_v24, %v1041_v9  ;;  %v1090_v35 = vmul.f32 %v3832_v0, %v3821_v59  ;;  %v1162_v21 = vmul.f32 %v3833_v6, %v2714_v49  ;;  %v1031_v14 = vmul.f32 %v3827_v33, %v3762_v51 }
 0x1d6   :  { %1221 = vrot.lane.b32.xlu0 %v791_v1, %s1766_s23  ;;  %1227 = vrot.lane.b32.xlu1 %v803_v63, %s1766_s23  ;;  %v1200_v15 = vpop.permute.xlu1 %1199  ;;  %v804_v1 = vadd.f32 %v780_v54, %v732_v47  ;;  %v1173_v61 = vadd.f32 %v1149_v42, %v1101_v45  ;;  %v323_v54 = vand.u32 255, %v2238_v27  ;;  %v1102_v47 = vadd.f32 %v1078_v55, %v1030_v5 }
 0x1d7   :  { %v1185_v63 = vadd.f32 %v1161_v52, %v1113_v31  ;;  %v1043_v9 = vmul.f32 %v3828_v25, %v3822_v2  ;;  %v1114_v59 = vadd.f32 %v1090_v35, %v1042_v10  ;;  %v3834_v17 = vmov 0.0  }
 0x1d8   :  { %v3070_v42 = vsel %vm393_vm13, 1.0, %v3834_v17  ;;  %v1079_v49 = vmul.f32 %v3829_v28, %v3768_v46  ;;  %v1151_v51 = vmul.f32 %v3830_v39, %v3788_v20  ;;  %vm391_vm14 = vcmp.ge.s32.totalorder %v323_v54, 16 }
 0x1d9   :  { %v1091_v44 = vmul.f32 %v3832_v0, %v3823_v29  ;;  %v1163_v2 = vmul.f32 %v3833_v6, %v2717_v22  ;;  %v1186_v24 = vadd.f32 %v1162_v21, %v1114_v59  ;;  %v1044_v20 = vmul.f32 %v3828_v25, %v3825_v53  ;;  %v3844_v59 = vld [vmem:[#allocation48_spill] sm:$0xff] }
 0x1da   :  { %1233 = vrot.lane.b32.xlu0 %v792_v4, %s1766_s23  ;;  %1239 = vrot.lane.b32.xlu1 %v804_v1, %s1766_s23  ;;  %v1212_v56 = vpop.permute.xlu1 %1211  ;;  %v1174_v4 = vadd.f32 %v1150_v11, %v1102_v47  ;;  %v1103_v46 = vadd.f32 %v1079_v49, %v1031_v14  ;;  %v3088_v5 = vsel %vm391_vm14, 1.0, %v3834_v17  ;;  %v1092_v22 = vmul.f32 %v3832_v0, %v3826_v43  ;;  %v3842_v47 = vld [vmem:[#allocation90_spill] sm:$0xff] }
 0x1db   :  { %v1259_v7 = vsel %vm1245_vm12, %v1200_v15, %v1212_v56  ;;  %v1115_v1 = vadd.f32 %v1091_v44, %v1043_v9  ;;  %v1164_v10 = vmul.f32 %v3833_v6, %v2724_v60  ;;  %v3843_v9 = vld [vmem:[#allocation53_spill] sm:$0xff]  ;;  %v716_v49 = vmul.f32 %v3799_v40, %v3844_v59 }
 0x1dc   :  { %v3064_v30 = vadd.f32 %v1259_v7, %v2939_v58  ;;  %v1175_v45 = vadd.f32 %v1151_v51, %v1103_v46  ;;  %v1116_v43 = vadd.f32 %v1092_v22, %v1044_v20  ;;  %v3846_v44 = vld [vmem:[#allocation5_spill] sm:$0xff]  ;;  %v3850_v46 = vld [vmem:[#allocation18_spill] sm:$0xff]  ;;  %v3853_v22 = vld [vmem:[#allocation44_spill] sm:$0xff] }
 0x1dd   :  { %v1187_v25 = vadd.f32 %v1163_v2, %v1115_v1  ;;  %v3847_v2 = vld [vmem:[#allocation70_spill] sm:$0xff]  ;;  %v3851_v1 = vld [vmem:[#allocation39_spill] sm:$0xff] }
 0x1de   :  { %1318 = vrot.lane.b32.xlu0 %v1173_v61, %s1767_s24  ;;  %1324 = vrot.lane.b32.xlu1 %v1185_v63, %s1767_s24  ;;  %v1224_v58 = vpop.permute.xlu1 %1223  ;;  %v1188_v60 = vadd.f32 %v1164_v10, %v1116_v43  ;;  %v3840_v61 = vld [vmem:[#allocation45_spill] sm:$0xff]  ;;  %v668_v63 = vmul.f32 %v2929_v23, %v2708_v37  ;;  %v1083_v20 = vmul.f32 %v3851_v1, %v3850_v46  ;;  %v3854_v10 = vld [vmem:[#allocation6_spill] sm:$0xff] }
 0x1df   :  { %v1253_v34 = vsel %vm1245_vm12, %v1212_v56, %v1224_v58  ;;  %v714_v54 = vmul.f32 %v3799_v40, %v3840_v61 }
 0x1e0   :  { %v1276_v52 = vmul.f32 %v3070_v42, %v1253_v34  ;;  %v740_v51 = vadd.f32 %v716_v49, %v668_v63  ;;  %v3862_v63 = vld [vmem:[#allocation9_spill] sm:$0xff]  ;;  %v3864_v49 = vld [vmem:[#allocation42_spill] sm:$0xff] }
 0x1e2   :  { %1330 = vrot.lane.b32.xlu0 %v1174_v4, %s1767_s24  ;;  %1336 = vrot.lane.b32.xlu1 %v1186_v24, %s1767_s24  ;;  %v1236_v29 = vpop.permute.xlu1 %1235  ;;  %v3094_v55 = vadd.f32 %v1276_v52, %v2945_v57  ;;  %v3849_v24 = vld [vmem:[#allocation74_spill] sm:$0xff] }
 0x1e3   :  { %v1247_v31 = vsel %vm1245_vm12, %v1224_v58, %v1236_v29  ;;  %v1265_v53 = vsel %vm1245_vm12, %v1236_v29, %v1200_v15  ;;  %v3845_v58 = vld [vmem:[#allocation85_spill] sm:$0xff] }
 0x1e4   :  { %v1274_v11 = vmul.f32 %v3088_v5, %v1265_v53  ;;  %v3104_v56 = vadd.f32 %v1247_v31, %v2941_v12  ;;  %v665_v12 = vmul.f32 %v2929_v23, %v2742_v48  ;;  %v3855_v31 = vld [vmem:[#allocation72_spill] sm:$0xff] }
 0x1e6   :  { %1342 = vrot.lane.b32.xlu0 %v1175_v45, %s1767_s24  ;;  %1348 = vrot.lane.b32.xlu1 %v1187_v25, %s1767_s24  ;;  %v3109_v57 = vadd.f32 %v1274_v11, %v2943_v19  ;;  %v3835_v19 = vld [vmem:[#allocation87_spill] sm:$0xff]  ;;  %v3856_v11 = vld [vmem:[#allocation24_spill] sm:$0xff] }
 0x1e7   :  { %v1084_v43 = vmul.f32 %v3851_v1, %v3856_v11 }
 0x1ea   :  { %1213 = vrot.lane.b32.xlu0 %v2979_v38, %s1766_s23  ;;  %1360 = vrot.lane.b32.xlu1 %v1188_v60, %s1767_s24  ;;  %v3836_v38 = vld [vmem:[#allocation40_spill] sm:$0xff]  ;;  %v3857_v60 = vld [vmem:[#allocation73_spill] sm:$0xff] }
 0x1eb   :  { %v713_v15 = vmul.f32 %v3799_v40, %v3836_v38  ;;  %v3852_v40 = vld [vmem:[#allocation71_spill] sm:$0xff] }
 0x1ec   :  { %v1155_v29 = vmul.f32 %v3853_v22, %v3852_v40 }
 0x1ed   :  { %v737_v0 = vadd.f32 %v713_v15, %v665_v12  ;;  %v1156_v12 = vmul.f32 %v3853_v22, %v3857_v60  ;;  %v3858_v15 = vld [vmem:[#allocation7_spill] sm:$0xff] }
 0x1ee   :  { %1225 = vrot.lane.b32.xlu0 %v2981_v16, %s1766_s23  ;;  %1326 = vrot.lane.b32.xlu1 %v2814_v26, %s1767_s24  ;;  %v3837_v16 = vld [vmem:[#allocation52_spill] sm:$0xff] }
 0x1ef   :  { %v666_v26 = vmul.f32 %v2929_v23, %v3837_v16  ;;  %v3848_v23 = vld [vmem:[#allocation36_spill] sm:$0xff] }
 0x1f0   :  { %v1035_v34 = vmul.f32 %v3848_v23, %v3847_v2  ;;  %v1036_v53 = vmul.f32 %v3848_v23, %v3855_v31 }
 0x1f1   :  { %v738_v35 = vadd.f32 %v714_v54, %v666_v26  ;;  %v1049_v26 = vmul.f32 %v3858_v15, %v2742_v48  ;;  %v3861_v54 = vld [vmem:[#allocation11_spill] sm:$0xff] }
 0x1f2   :  { %1237 = vrot.lane.b32.xlu0 %v2983_v50, %s1766_s23  ;;  %1338 = vrot.lane.b32.xlu1 %v2818_v36, %s1767_s24  ;;  %v3838_v50 = vld [vmem:[#allocation88_spill] sm:$0xff]  ;;  %v3839_v36 = vld [vmem:[#allocation49_spill] sm:$0xff]  ;;  %v1107_v25 = vadd.f32 %v1083_v20, %v1035_v34  ;;  %v1172_v2 = vmul.f32 %v3861_v54, %v3849_v24  ;;  %v1032_v34 = vmul.f32 %v3827_v33, %v3763_v8 }
 0x1f3   :  { %v785_v6 = vmul.f32 %v3839_v36, %v2784_v62  ;;  %v786_v7 = vmul.f32 %v3839_v36, %v2787_v3  ;;  %v788_v52 = vmul.f32 %v3839_v36, %v3849_v24  ;;  %v1439_v8 = vld [vmem:[%s3470_s4] sm:$0xff] }
 0x1f4   :  { %v1536_v33 = vld [vmem:[%s3472_s6] sm:$0xff] }
 0x1f5   :  { %v809_v21 = vadd.f32 %v785_v6, %v737_v0  ;;  %v810_v14 = vadd.f32 %v786_v7, %v738_v35  ;;  %v812_v45 = vadd.f32 %v788_v52, %v740_v51  ;;  %v3859_v0 = vld [vmem:[#allocation47_spill] sm:$0xff]  ;;  %v1169_v35 = vmul.f32 %v3861_v54, %v2784_v62  ;;  %v1440_v62 = vld [vmem:[%s3470_s4 + $0x8] sm:$0xff] }
 0x1f6   :  { %1322 = vrot.lane.b32.xlu0 %v3835_v19, %s1767_s24  ;;  %1350 = vrot.lane.b32.xlu1 %v2820_v41, %s1767_s24  ;;  %v3841_v41 = vld [vmem:[#allocation89_spill] sm:$0xff]  ;;  %v1179_v19 = vadd.f32 %v1155_v29, %v1107_v25 }
 0x1fa   :  { %1334 = vrot.lane.b32.xlu0 %v3838_v50, %s1767_s24  ;;  %1362 = vrot.lane.b32.xlu1 %v2833_v13, %s1767_s24  ;;  %v787_v13 = vmul.f32 %v3839_v36, %v3843_v9  ;;  %v1108_v50 = vadd.f32 %v1084_v43, %v1036_v53  ;;  %v3860_v36 = vld [vmem:[#allocation8_spill] sm:$0xff] }
 0x1fb   :  { %v1097_v6 = vmul.f32 %v3860_v36, %v3836_v38  ;;  %v1098_v48 = vmul.f32 %v3860_v36, %v3840_v61  ;;  %v1099_v51 = vmul.f32 %v3860_v36, %v3864_v49  ;;  %v1171_v61 = vmul.f32 %v3861_v54, %v3843_v9 }
 0x1fc   :  { %v811_v4 = vadd.f32 %v787_v13, %v3845_v58  ;;  %v1080_v9 = vmul.f32 %v3829_v28, %v3769_v18  ;;  %v3225_v18 = vpop.permute.xlu1 %1320 }
 0x1fd   :  { %v1121_v7 = vadd.f32 %v1097_v6, %v1049_v26  ;;  %v3867_v6 = vld [vmem:[#allocation96_spill] sm:$0xff] }
 0x1fe   :  { %1346 = vrot.lane.b32.xlu0 %v3841_v41, %s1767_s24  ;;  %1207 = vrot.lane.b32.xlu1 %v809_v21, %s1766_s23  ;;  %v1180_v21 = vadd.f32 %v1156_v12, %v1108_v50  ;;  %v1050_v41 = vmul.f32 %v3858_v15, %v3837_v16 }
 0x1ff   :  { %v1193_v38 = vadd.f32 %v1169_v35, %v1121_v7 }
 0x200   :  { %v1122_v13 = vadd.f32 %v1098_v48, %v1050_v41  ;;  %v3229_v28 = vpop.permute.xlu1 %1332  ;;  %v3868_v41 = vld [vmem:[#allocation83_spill] sm:$0xff] }
 0x202   :  { %1358 = vrot.lane.b32.xlu0 %v3842_v47, %s1767_s24  ;;  %1219 = vrot.lane.b32.xlu1 %v810_v14, %s1766_s23  ;;  %v1170_v14 = vmul.f32 %v3861_v54, %v2787_v3  ;;  %v3863_v47 = vld [vmem:[#allocation54_spill] sm:$0xff] }
 0x203   :  { %v1051_v16 = vmul.f32 %v3858_v15, %v3863_v47 }
 0x204   :  { %v1194_v58 = vadd.f32 %v1170_v14, %v1122_v13  ;;  %v3869_v14 = vld [vmem:[#allocation21_spill] sm:$0xff]  ;;  %v3871_v13 = vld [vmem:[#allocation95_spill] sm:$0xff] }
 0x205   :  { %v1123_v3 = vadd.f32 %v1099_v51, %v1051_v16 }
 0x206   :  { %1205 = vrot.lane.b32.xlu0 %v3846_v44, %s1766_s23  ;;  %1231 = vrot.lane.b32.xlu1 %v811_v4, %s1766_s23  ;;  %v1052_v4 = vmul.f32 %v3858_v15, %v2708_v37  ;;  %v1100_v44 = vmul.f32 %v3860_v36, %v3844_v59  ;;  %v1152_v37 = vmul.f32 %v3830_v39, %v3789_v32  ;;  %v3227_v32 = vpop.permute.xlu0 %1472  ;;  %v3866_v15 = vld [vmem:[#allocation84_spill] sm:$0xff] }
 0x207   :  { %v1195_v23 = vadd.f32 %v1171_v61, %v1123_v3  ;;  %v1104_v59 = vadd.f32 %v1080_v9, %v1032_v34 }
 0x208   :  { %v1124_v52 = vadd.f32 %v1100_v44, %v1052_v4 }
 0x209   :  { %v1176_v1 = vadd.f32 %v1152_v37, %v1104_v59  ;;  %v3872_v59 = vld [vmem:[#allocation61_spill] sm:$0xff] }
 0x20a   :  { %1217 = vrot.lane.b32.xlu0 %v3854_v10, %s1766_s23  ;;  %1243 = vrot.lane.b32.xlu1 %v812_v45, %s1766_s23  ;;  %v1196_v46 = vadd.f32 %v1172_v2, %v1124_v52  ;;  %v3231_v39 = vpop.permute.xlu0 %1457  ;;  %v3865_v10 = vld [vmem:[#allocation15_spill] sm:$0xff] }
 0x20e   :  { %1229 = vrot.lane.b32.xlu0 %v3859_v0, %s1766_s23  ;;  %1344 = vrot.lane.b32.xlu1 %v1179_v19, %s1767_s24 }
 0x212   :  { %1241 = vrot.lane.b32.xlu0 %v3862_v63, %s1766_s23  ;;  %1356 = vrot.lane.b32.xlu1 %v1180_v21, %s1767_s24 }
 0x216   :  { %1328 = vrot.lane.b32.xlu0 %v1193_v38, %s1767_s24  ;;  %1452 = vperm.xlu1 %1724, %v1440_v62   ;;  %v3870_v38 = vld [vmem:[#allocation60_spill] sm:$0xff] }
 0x217   :  { %v330_v47 = vand.u32 255, %v3870_v38 }
 0x219   :  { %vm404_vm0 = vcmp.lt.s32.totalorder %v330_v47, 240 }
 0x21a   :  { %1340 = vrot.lane.b32.xlu0 %v1194_v58, %s1767_s24  ;;  %v3272_v4 = vsel %vm404_vm0, 1.0, %v3834_v17 }
 0x21e   :  { %1352 = vrot.lane.b32.xlu0 %v1195_v23, %s1767_s24 }
 0x222   :  { %1364 = vrot.lane.b32.xlu0 %v1196_v46, %s1767_s24 }
 0x226   :  { %1354 = vrot.lane.b32.xlu0 %v1176_v1, %s1767_s24 }
 0x22a   :  { %1447 = vperm.xlu0 %1722, %v1439_v8  }
 0x22e   :  { %1539 = vperm.xlu0 %1722, %v1536_v33  }
 0x23c   :  { %v1202_v24 = vpop.permute.xlu1 %1201 }
 0x240   :  { %v1198_v20 = vpop.permute.xlu0 %1197  ;;  %v1204_v40 = vpop.permute.xlu1 %1203 }
 0x244   :  { %v1210_v22 = vpop.permute.xlu0 %1209  ;;  %v1216_v29 = vpop.permute.xlu1 %1215 }
 0x245   :  { %v1258_v45 = vsel %vm1245_vm12, %v1198_v20, %v1210_v22 }
 0x246   :  { %v1295_v31 = vadd.f32 %v1258_v45, %v3865_v10 }
 0x248   :  { %v1222_v53 = vpop.permute.xlu0 %1221  ;;  %v3236_v25 = vpop.permute.xlu1 %1227 }
 0x249   :  { %v1252_v11 = vsel %vm1245_vm12, %v1210_v22, %v1222_v53  ;;  %v1255_v43 = vsel %vm1245_vm12, %v1216_v29, %v3236_v25  ;;  %v3873_v22 = vld [vmem:[#allocation64_spill] sm:$0xff] }
 0x24a   :  { %v1272_v60 = vmul.f32 %v3070_v42, %v1252_v11  ;;  %v1284_v12 = vmul.f32 %v3070_v42, %v1255_v43  ;;  %v344_v45 = vand.u32 255, %v3873_v22 }
 0x24c   :  { %v1234_v19 = vpop.permute.xlu0 %1233  ;;  %v3246_v26 = vadd.f32 %v1272_v60, %v3866_v15  ;;  %v1240_v0 = vpop.permute.xlu1 %1239  ;;  %v1308_v54 = vadd.f32 %v1284_v12, %v3867_v6  ;;  %v3874_v12 = vld [vmem:[#allocation14_spill] sm:$0xff]  ;;  %vm406_vm1 = vcmp.lt.s32.totalorder %v344_v45, 240 }
 0x24d   :  { %v1246_v50 = vsel %vm1245_vm12, %v1222_v53, %v1234_v19  ;;  %v1264_v36 = vsel %vm1245_vm12, %v1234_v19, %v1198_v20  ;;  %v1267_v35 = vsel %vm1245_vm12, %v1240_v0, %v1204_v40  ;;  %v3304_v6 = vsel %vm406_vm1, 1.0, %v3834_v17 }
 0x24e   :  { %v1270_v21 = vmul.f32 %v3088_v5, %v1264_v36  ;;  %v3257_v7 = vadd.f32 %v1246_v50, %v3868_v41  ;;  %v1282_v63 = vmul.f32 %v3088_v5, %v1267_v35  ;;  %v1261_v50 = vsel %vm1245_vm12, %v1204_v40, %v1216_v29  ;;  %v3876_v29 = vld [vmem:[#allocation16_spill] sm:$0xff] }
 0x250   :  { %v3260_v48 = vpop.permute.xlu0 %1318  ;;  %v1294_v62 = vadd.f32 %v1270_v21, %v3869_v14  ;;  %v1325_v16 = vpop.permute.xlu1 %1324  ;;  %v1306_v49 = vadd.f32 %v1282_v63, %v3871_v13  ;;  %v3875_v21 = vld [vmem:[#allocation10_spill] sm:$0xff]  ;;  %v1249_v13 = vsel %vm1245_vm12, %v3236_v25, %v1240_v0 }
 0x251   :  { %v1307_v41 = vadd.f32 %v1261_v50, %v3875_v21 }
 0x254   :  { %v1331_v51 = vpop.permute.xlu0 %1330  ;;  %v1337_v61 = vpop.permute.xlu1 %1336 }
 0x255   :  { %v1379_v58 = vsel %vm1366_vm15, %v3260_v48, %v1331_v51  ;;  %v1382_v11 = vsel %vm1366_vm15, %v1325_v16, %v1337_v61 }
 0x256   :  { %v3269_v3 = vadd.f32 %v1379_v58, %v1294_v62  ;;  %v1427_v36 = vadd.f32 %v1382_v11, %v1306_v49 }
 0x258   :  { %v3274_v44 = vpop.permute.xlu0 %1342  ;;  %v1349_v2 = vpop.permute.xlu1 %1348  ;;  %v1487_v38 = vadd.f32 %v3876_v29, %v1427_v36  ;;  %v3879_v36 = vld [vmem:[#allocation91_spill] sm:$0xff] }
 0x259   :  { %v1373_v23 = vsel %vm1366_vm15, %v1331_v51, %v3274_v44  ;;  %v1376_v43 = vsel %vm1366_vm15, %v1337_v61, %v1349_v2 }
 0x25a   :  { %v1392_v34 = vmul.f32 %v3272_v4, %v1373_v23 }
 0x25c   :  { %v3280_v52 = vadd.f32 %v1392_v34, %v1295_v31  ;;  %v1214_v9 = vpop.permute.xlu0 %1213  ;;  %v1361_v37 = vpop.permute.xlu1 %1360 }
 0x25d   :  { %v1260_v46 = vsel %vm1245_vm12, %v1202_v24, %v1214_v9  ;;  %v1388_v63 = vsel %vm1366_vm15, %v1361_v37, %v1325_v16  ;;  %v1370_v17 = vsel %vm1366_vm15, %v1349_v2, %v1361_v37  ;;  %v1511_v37 = vmax.f32 %v1487_v38, 0.0 }
 0x25e   :  { %v1303_v1 = vadd.f32 %v1260_v46, %v3872_v59  ;;  %v1406_v16 = vmul.f32 %v3304_v6, %v1388_v63  ;;  %v1429_v23 = vadd.f32 %v1370_v17, %v1308_v54  ;;  %v3877_v46 = vld [vmem:[#allocation94_spill] sm:$0xff]  ;;  %v3878_v54 = vld [vmem:[#allocation20_spill] sm:$0xff] }
 0x25f   :  { %v1309_v2 = vadd.f32 %v1249_v13, %v3877_v46 }
 0x260   :  { %v1226_v8 = vpop.permute.xlu0 %1225  ;;  %v3285_v33 = vpop.permute.xlu1 %1326 }
 0x261   :  { %v1254_v14 = vsel %vm1245_vm12, %v1214_v9, %v1226_v8  ;;  %v1430_v45 = vadd.f32 %v1406_v16, %v1309_v2 }
 0x262   :  { %v1280_v51 = vmul.f32 %v3070_v42, %v1254_v14 }
 0x263   :  { %v1490_v38 = vadd.f32 %v3876_v29, %v1430_v45 }
 0x264   :  { %v1238_v20 = vpop.permute.xlu0 %1237  ;;  %v3288_v10 = vpop.permute.xlu1 %1338  ;;  %v1304_v11 = vadd.f32 %v1280_v51, %v3878_v54 }
 0x265   :  { %v1266_v53 = vsel %vm1245_vm12, %v1238_v20, %v1202_v24  ;;  %v1404_v24 = vmul.f32 %v3272_v4, %v1376_v43  ;;  %v1248_v25 = vsel %vm1245_vm12, %v1226_v8, %v1238_v20 }
 0x266   :  { %v1278_v31 = vmul.f32 %v3088_v5, %v1266_v53 }
 0x267   :  { %v1428_v49 = vadd.f32 %v1404_v24, %v1307_v41  ;;  %v1305_v24 = vadd.f32 %v1248_v25, %v3879_v36  ;;  %v3880_v25 = vld [vmem:[#allocation93_spill] sm:$0xff] }
 0x268   :  { %v1323_v60 = vpop.permute.xlu0 %1322  ;;  %v1302_v19 = vadd.f32 %v1278_v31, %v3874_v12  ;;  %v3298_v15 = vpop.permute.xlu1 %1350  ;;  %v1489_v12 = vadd.f32 %v3876_v29, %v1429_v23 }
 0x269   :  { %v1488_v0 = vadd.f32 %v3876_v29, %v1428_v49 }
 0x26a   :  { %v1513_v17 = vmax.f32 %v1489_v12, 0.0  ;;  %v3881_v12 = vld [vmem:[#allocation59_spill] sm:$0xff] }
 0x26c   :  { %v1335_v35 = vpop.permute.xlu0 %1334  ;;  %v3311_v62 = vpop.permute.xlu1 %1362 }
 0x26d   :  { %v1381_v40 = vsel %vm1366_vm15, %v1323_v60, %v1335_v35 }
 0x26e   :  { %v1423_v47 = vadd.f32 %v1381_v40, %v1302_v19 }
 0x270   :  { %v1483_v61 = vadd.f32 %v3231_v39, %v1423_v47  ;;  %v1347_v58 = vpop.permute.xlu0 %1346  ;;  %v1208_v34 = vpop.permute.xlu1 %1207 }
 0x271   :  { %v1375_v9 = vsel %vm1366_vm15, %v1335_v35, %v1347_v58 }
 0x272   :  { %v1507_v59 = vmax.f32 %v1483_v61, 0.0  ;;  %v1400_v22 = vmul.f32 %v3272_v4, %v1375_v9 }
 0x274   :  { %v3331_v53 = vpack.c.bf16 %v1511_v37, %v1507_v59  ;;  %v1424_v31 = vadd.f32 %v1400_v22, %v1303_v1  ;;  %v1359_v43 = vpop.permute.xlu0 %1358  ;;  %v1220_v8 = vpop.permute.xlu1 %1219  ;;  %v1512_v1 = vmax.f32 %v1488_v0, 0.0 }
 0x275   :  { %v1369_v19 = vsel %vm1366_vm15, %v1347_v58, %v1359_v43  ;;  %v1387_v50 = vsel %vm1366_vm15, %v1359_v43, %v1323_v60  ;;  %v1514_v58 = vmax.f32 %v1490_v38, 0.0  ;;  %v3884_v38 = vld [vmem:[#allocation92_spill] sm:$0xff] }
 0x276   :  { %v1402_v20 = vmul.f32 %v3304_v6, %v1387_v50  ;;  %v1425_v35 = vadd.f32 %v1369_v19, %v1304_v11  ;;  %v1484_v21 = vadd.f32 %v3231_v39, %v1424_v31  ;;  %v1383_v31 = vsel %vm1366_vm15, %v3285_v33, %v3288_v10  ;;  %v3882_v50 = vld [vmem:[#allocation56_spill] sm:$0xff] }
 0x277   :  { %v1377_v11 = vsel %vm1366_vm15, %v3288_v10, %v3298_v15  ;;  %v3883_v10 = vld [vmem:[#allocation86_spill] sm:$0xff] }
 0x278   :  { %v1426_v41 = vadd.f32 %v1402_v20, %v1305_v24  ;;  %v1485_v63 = vadd.f32 %v3231_v39, %v1425_v35  ;;  %v1206_v14 = vpop.permute.xlu0 %1205  ;;  %v1508_v40 = vmax.f32 %v1484_v21, 0.0  ;;  %v1232_v16 = vpop.permute.xlu1 %1231  ;;  %v1408_v20 = vmul.f32 %v3272_v4, %v1377_v11 }
 0x279   :  { %v1257_v21 = vsel %vm1245_vm12, %v1220_v8, %v1232_v16 }
 0x27a   :  { %v1509_v47 = vmax.f32 %v1485_v63, 0.0  ;;  %v3344_v13 = vpack.c.bf16 %v1512_v1, %v1508_v40  ;;  %v1486_v60 = vadd.f32 %v3231_v39, %v1426_v41 }
 0x27c   :  { %v3347_v49 = vpack.c.bf16 %v1513_v17, %v1509_v47  ;;  %v1218_v51 = vpop.permute.xlu0 %1217  ;;  %v1510_v61 = vmax.f32 %v1486_v60, 0.0  ;;  %v1244_v46 = vpop.permute.xlu1 %1243  ;;  %v1389_v47 = vsel %vm1366_vm15, %v3311_v62, %v3285_v33 }
 0x27d   :  { %v1269_v29 = vsel %vm1245_vm12, %v1244_v46, %v1208_v34  ;;  %v1262_v54 = vsel %vm1245_vm12, %v1206_v14, %v1218_v51 }
 0x27e   :  { %v3349_v23 = vpack.c.bf16 %v1514_v58, %v1510_v61  ;;  %v1290_v39 = vmul.f32 %v3088_v5, %v1269_v29  ;;  %v1311_v19 = vadd.f32 %v1262_v54, %v3881_v12  ;;  %v1371_v58 = vsel %vm1366_vm15, %v3298_v15, %v3311_v62  ;;  %v3886_v29 = vld [vmem:[#allocation51_spill] sm:$0xff] }
 0x280   :  { %v1230_v9 = vpop.permute.xlu0 %1229  ;;  %v1314_v36 = vadd.f32 %v1290_v39, %v3882_v50  ;;  %v1345_v40 = vpop.permute.xlu1 %1344  ;;  %v1432_v60 = vadd.f32 %v1408_v20, %v1311_v19 }
 0x281   :  { %v1256_v22 = vsel %vm1245_vm12, %v1218_v51, %v1230_v9 }
 0x282   :  { %v1288_v43 = vmul.f32 %v3070_v42, %v1256_v22  ;;  %v1410_v22 = vmul.f32 %v3304_v6, %v1389_v47 }
 0x284   :  { %v1242_v2 = vpop.permute.xlu0 %1241  ;;  %v1312_v17 = vadd.f32 %v1288_v43, %v3884_v38  ;;  %v1357_v54 = vpop.permute.xlu1 %1356 }
 0x285   :  { %v1268_v37 = vsel %vm1245_vm12, %v1242_v2, %v1206_v14  ;;  %v1250_v1 = vsel %vm1245_vm12, %v1230_v9, %v1242_v2  ;;  %v1263_v14 = vsel %vm1245_vm12, %v1208_v34, %v1220_v8  ;;  %v1292_v9 = vmul.f32 %v3070_v42, %v1257_v21  ;;  %v3885_v34 = vld [vmem:[#allocation55_spill] sm:$0xff] }
 0x286   :  { %v1286_v59 = vmul.f32 %v3088_v5, %v1268_v37  ;;  %v1313_v8 = vadd.f32 %v1250_v1, %v3885_v34  ;;  %v1315_v37 = vadd.f32 %v1263_v14, %v3886_v29  ;;  %v1386_v21 = vsel %vm1366_vm15, %v1357_v54, %v3225_v18 }
 0x288   :  { %v1310_v0 = vadd.f32 %v1286_v59, %v3880_v25  ;;  %v1329_v45 = vpop.permute.xlu0 %1328  ;;  %v1433_v25 = vadd.f32 %v1371_v58, %v1312_v17  ;;  %v1434_v11 = vadd.f32 %v1410_v22, %v1313_v8  ;;  %v1398_v8 = vmul.f32 %v3304_v6, %v1386_v21 }
 0x28a   :  { %v1431_v5 = vadd.f32 %v1383_v31, %v1310_v0  ;;  %v1251_v0 = vsel %vm1245_vm12, %v1232_v16, %v1244_v46  ;;  %v1492_v31 = vadd.f32 %v3883_v10, %v1432_v60  ;;  %v1493_v16 = vadd.f32 %v3883_v10, %v1433_v25 }
 0x28b   :  { %v1494_v17 = vadd.f32 %v3883_v10, %v1434_v11 }
 0x28c   :  { %v1341_v24 = vpop.permute.xlu0 %1340  ;;  %v1491_v41 = vadd.f32 %v3883_v10, %v1431_v5  ;;  %v3887_v5 = vld [vmem:[#allocation67_spill] sm:$0xff] }
 0x28d   :  { %v1384_v35 = vsel %vm1366_vm15, %v1329_v45, %v1341_v24  ;;  %v1316_v43 = vadd.f32 %v1292_v9, %v3887_v5  ;;  %v1380_v9 = vsel %vm1366_vm15, %v3225_v18, %v3229_v28  ;;  %v1518_v10 = vmax.f32 %v1494_v17, 0.0 }
 0x28e   :  { %v1435_v63 = vadd.f32 %v1384_v35, %v1314_v36  ;;  %v1515_v59 = vmax.f32 %v1491_v41, 0.0  ;;  %v3888_v36 = vld [vmem:[#allocation65_spill] sm:$0xff]  ;;  %v1374_v35 = vsel %vm1366_vm15, %v3229_v28, %v1345_v40  ;;  %v1516_v41 = vmax.f32 %v1492_v31, 0.0 }
 0x28f   :  { %v1396_v34 = vmul.f32 %v3272_v4, %v1374_v35  ;;  %v1419_v18 = vadd.f32 %v1380_v9, %v3109_v57 }
 0x290   :  { %v1495_v51 = vadd.f32 %v3227_v32, %v1435_v63  ;;  %v1353_v61 = vpop.permute.xlu0 %1352 }
 0x291   :  { %v1378_v2 = vsel %vm1366_vm15, %v1341_v24, %v1353_v61  ;;  %v1317_v24 = vadd.f32 %v1251_v0, %v3888_v36  ;;  %v1453_v28 = vpop.permute.xlu1 %1452  ;;  %v1728_v36 = vld [vmem:[%s3466_s0] sm:$0xff] }
 0x292   :  { %v1519_v33 = vmax.f32 %v1495_v51, 0.0  ;;  %v1412_v39 = vmul.f32 %v3272_v4, %v1378_v2  ;;  %v1517_v51 = vmax.f32 %v1493_v16, 0.0  ;;  %v1479_v27 = vadd.f32 %v1453_v28, %v1419_v18  ;;  %v1729_v16 = vld [vmem:[%s3466_s0 + $0x10] sm:$0xff] }
 0x294   :  { %v1532_v15 = vpack.c.bf16 %v1519_v33, %v1515_v59  ;;  %v1436_v62 = vadd.f32 %v1412_v39, %v1315_v37  ;;  %v1365_v42 = vpop.permute.xlu0 %1364  ;;  %v1420_v37 = vadd.f32 %v1396_v34, %v3064_v30  ;;  %v1503_v22 = vmax.f32 %v1479_v27, 0.0 }
 0x295   :  { %v1372_v12 = vsel %vm1366_vm15, %v1353_v61, %v1365_v42  ;;  %v1390_v19 = vsel %vm1366_vm15, %v1365_v42, %v1329_v45 }
 0x296   :  { %v1496_v50 = vadd.f32 %v3227_v32, %v1436_v62  ;;  %v1414_v46 = vmul.f32 %v3304_v6, %v1390_v19  ;;  %v1437_v20 = vadd.f32 %v1372_v12, %v1316_v43 }
 0x298   :  { %v1355_v1 = vpop.permute.xlu0 %1354  ;;  %v1520_v45 = vmax.f32 %v1496_v50, 0.0  ;;  %v1438_v63 = vadd.f32 %v1414_v46, %v1317_v24  ;;  %v1497_v14 = vadd.f32 %v3227_v32, %v1437_v20 }
 0x299   :  { %v1367_v38 = vsel %vm1366_vm15, %v3274_v44, %v1355_v1 }
 0x29a   :  { %v1417_v47 = vadd.f32 %v1367_v38, %v3246_v26  ;;  %v1533_v60 = vpack.c.bf16 %v1520_v45, %v1516_v41  ;;  %v1521_v61 = vmax.f32 %v1497_v14, 0.0  ;;  %v1498_v58 = vadd.f32 %v3227_v32, %v1438_v63  ;;  %v1730_v41 = vld [vmem:[%s3466_s0 + $0x8] sm:$0xff]  ;;  %v1731_v63 = vld [vmem:[%s3466_s0 + $0x18] sm:$0xff] }
 0x29b   :  { %v1385_v26 = vsel %vm1366_vm15, %v1355_v1, %v3260_v48  ;;  %v1368_v32 = vsel %vm1366_vm15, %v1345_v40, %v1357_v54  ;;  %v1422_v48 = vadd.f32 %v1398_v8, %v3104_v56  ;;  %v1480_v40 = vadd.f32 %v1453_v28, %v1420_v37 }
 0x29c   :  { %1556 = vmatprep.subr.bf16.mxu0 %v1533_v60  ;;  %v1534_v44 = vpack.c.bf16 %v1521_v61, %v1517_v51  ;;  %v1522_v2 = vmax.f32 %v1498_v58, 0.0  ;;  %v1394_v4 = vmul.f32 %v3304_v6, %v1385_v26  ;;  %v1421_v59 = vadd.f32 %v1368_v32, %v3094_v55 }
 0x29d   :  { %1557 = vmatpush1.bf16.msra.mxu0 %v1532_v15 }
 0x29e   :  { %1558 = vmatprep.subr.bf16.mxu0 %v3344_v13  ;;  %v1535_v29 = vpack.c.bf16 %v1522_v2, %v1518_v10  ;;  %v1481_v33 = vadd.f32 %v1453_v28, %v1421_v59  ;;  %v1482_v13 = vadd.f32 %v1453_v28, %v1422_v48  ;;  %v1418_v57 = vadd.f32 %v1394_v4, %v3257_v7 }
 0x2a0   :  { %1597 = vmatprep.subr.bf16.mxu1 %v1535_v29  ;;  %v1505_v25 = vmax.f32 %v1481_v33, 0.0  ;;  %v1506_v0 = vmax.f32 %v1482_v13, 0.0 }
 0x2a1   :  { %1559 = vmatpush1.bf16.msra.mxu0 %v3331_v53  ;;  %1598 = vmatpush1.bf16.msra.mxu1 %v1534_v44  ;;  %v1504_v53 = vmax.f32 %v1480_v40, 0.0 }
 0x2a2   :  { %1599 = vmatprep.subr.bf16.mxu1 %v3349_v23 }
 0x2a5   :  { %v1448_v39 = vpop.permute.xlu0 %1447  ;;  %1600 = vmatpush1.bf16.msra.mxu1 %v3347_v49 }
 0x2a6   :  { %v1475_v30 = vadd.f32 %v1448_v39, %v3269_v3  ;;  %v1476_v55 = vadd.f32 %v1448_v39, %v3280_v52  ;;  %v1477_v56 = vadd.f32 %v1448_v39, %v1417_v47  ;;  %v1478_v6 = vadd.f32 %v1448_v39, %v1418_v57  ;;  %v1523_v3 = vld [vmem:[%s3471_s5] sm:$0xf] }
 0x2a8   :  { %v1499_v15 = vmax.f32 %v1475_v30, 0.0  ;;  %v1501_v62 = vmax.f32 %v1477_v56, 0.0  ;;  %v1500_v42 = vmax.f32 %v1476_v55, 0.0  ;;  %v1502_v31 = vmax.f32 %v1478_v6, 0.0 }
 0x2a9   :  { %v1540_v52 = vpop.permute.xlu0 %1539 }
 0x2aa   :  { %v1525_v23 = vpack.c.bf16 %v1504_v53, %v1500_v42  ;;  %v1527_v54 = vpack.c.bf16 %v1506_v0, %v1502_v31  ;;  %v1524_v7 = vpack.c.bf16 %v1503_v22, %v1499_v15  ;;  %v1526_v11 = vpack.c.bf16 %v1505_v25, %v1501_v62 }
 0x2ac   :  { %1560 = vmatprep.subr.bf16.mxu0 %v1525_v23  ;;  %1601 = vmatprep.subr.bf16.mxu1 %v1527_v54 }
 0x2ad   :  { %1561 = vmatpush1.bf16.msra.mxu0 %v1524_v7  ;;  %1602 = vmatpush1.bf16.msra.mxu1 %v1526_v11 }
 0x2b0   :  { %1673 = vmatmul.mubr.msk.bf16.vlgmr.msra.gmra.mxu0 %vm1542_vm2, %v1523_v3  ;;  %1674 = vmatmul.mubr.msk.bf16.vlgmr.msra.gmra.mxu1 %vm1542_vm2, %v1523_v3 }
 0x370   :  { %v1580_v49 = vpop.f32.mrf.mxu0  ;;  %v1621_v5 = vpop.f32.mrf.mxu1 }
 0x371   :  { %v1581_v43 = vadd.f32 %v1580_v49, %v1540_v52  ;;  %v1622_v12 = vadd.f32 %v1621_v5, %v1540_v52 }
 0x372   :  { %v1582_v19 = vpop.f32.mrf.mxu0  ;;  %v1623_v50 = vpop.f32.mrf.mxu1 }
 0x373   :  { %v1628_v24 = vadd.f32 %v1728_v36, %v1581_v43  ;;  %v1630_v46 = vadd.f32 %v1729_v16, %v1622_v12  ;;  %v1583_v20 = vadd.f32 %v1582_v19, %v1540_v52  ;;  %v1624_v35 = vadd.f32 %v1623_v50, %v1540_v52 }
 0x374   :  { %v1584_v21 = vpop.f32.mrf.mxu0  ;;  %v1625_v1 = vpop.f32.mrf.mxu1 }
 0x375   :  { %1632 = vst [vmem:[#allocation2] sm:$0xff] %v1628_v24  ;;  %1634 = vst [vmem:[#allocation2 + $0x10] sm:$0xff] %v1630_v46  ;;  %v1629_v45 = vadd.f32 %v1730_v41, %v1583_v20  ;;  %v1631_v14 = vadd.f32 %v1731_v63, %v1624_v35 }
 0x376   :  { %v1585_v38 = vpop.f32.mrf.mxu0  ;;  %v1626_v17 = vpop.f32.mrf.mxu1 }
 0x377   :  { %1633 = vst [vmem:[#allocation2 + $0x8] sm:$0xff] %v1629_v45  ;;  %1635 = vst [vmem:[#allocation2 + $0x18] sm:$0xff] %v1631_v14 }
 0x378   :  { %1743 = shalt.err (!%p1740_p4)
}
 0x379   :  { %1645 = dma.vmem_to_hbm [thread:$0]  %s1643_s8, 512, %s3473_s7, [#allocation3]  }
 0x37a   :  { %1752 = dma.done.wait [#allocation3], 512  }
 0x37b   :  { %1753 = vsyncadd [#allocation3], 4294966784 }
 0x37c   :  { %1649 = vsyncpa [#allocation3], 1 }

</bundles_post_ra>
